<compile_context>
chip_gen: v5e
topology: v5e:2x2
jax: 0.10.0
libtpu: 0.0.40
codegen_flags: <defaults>
</compile_context>

<pallas_src>
import functools
import math

import numpy as np

import jax
import jax.numpy as jnp
from jax.experimental import pallas as pl
from jax.experimental.pallas import tpu as pltpu

NEG_SLOPE = 0.01  # nn.LeakyReLU() default negative_slope


def _lrelu(v):
    return jnp.where(v > 0, v, NEG_SLOPE * v)


def _round_up(a, m):
    return (a + m - 1) // m * m


def _ws_layout(F, Hd):
    """Row offsets of the packed small-weights tensor (16-row aligned for bf16)."""
    def up16(v):
        return (v + 15) // 16 * 16
    r_wi = 0                               # GRU input weights   (2F x 6Hd)
    r_wh = up16(r_wi + 2 * F)              # GRU hidden weights  (2Hd x 6Hd)
    r_fh = up16(r_wh + 2 * Hd)             # [fc1 h-part | fc2 z1-part] (2Hd x (2Hd+2))
    r_fw = up16(r_fh + 2 * Hd)             # [fc1 w-part | fc2 a-part]  (Hd  x (2Hd+2))
    rows = up16(r_fw + Hd)
    return r_wi, r_wh, r_fh, r_fw, rows


# ---------------------------------------------------------------------------
# The single fused kernel.
#
# Data layout:
#   x_ref  : (B*H, W*C)       rows = (batch, height), lanes = (width, chan)
#   cols1  : (B*HP1, 3*LB1)   conv1 im2col, lane block ki holds x row (b, i+ki)
#   y1     : (B*HP1, W1*2*O1) conv1 output rows, lanes = (out col, stacked critic chans)
#   cols2  : (B*HP2, 3*LB2)   conv2 im2col over y1 rows
#   seq    : (B*HP2, 2*F)     conv2 output rows, lanes = (critic, feature)
#   xp_ref : (B*HP2, 6*Hd)    hoisted GRU input projections, gate order [r1 r2 z1 z2 n1 n2]
# ---------------------------------------------------------------------------
def _double_critic_kernel(x_ref, wa_ref, m1_ref, m2_ref, ws_ref, b_ref,
                          o_ref, cols1_ref, cols2_ref, xp_ref,
                          *, B, H, W, Hd):
    f32, bf16 = jnp.float32, jnp.bfloat16
    WC = x_ref.shape[1]
    H1, H2 = H - 2, H - 4
    T = H2
    F = W - 4
    HP1 = cols1_ref.shape[0] // B
    HP2 = cols2_ref.shape[0] // B
    LB1 = cols1_ref.shape[1] // 3
    LB2 = cols2_ref.shape[1] // 3
    K1 = m1_ref.shape[1]                 # W1 * 2*O1 (conv1 output row width)
    NQ = m2_ref.shape[1]                 # 2 * F     (conv2 output row width)
    G = 6 * Hd                           # packed gate width
    Hd2 = 2 * Hd
    r_wi, r_wh, r_fh, r_fw, _ = _ws_layout(F, Hd)

    # Zero the im2col scratch: the padded lanes/rows feed the matmuls, and stale VMEM
    # garbage may be NaN (NaN * 0 == NaN).  The padding interleaves with the written
    # regions at vreg granularity, so a full memset costs the same as selective zeroing.
    cols1_ref[...] = jnp.zeros_like(cols1_ref)
    cols2_ref[...] = jnp.zeros_like(cols2_ref)

    # ---- conv1 im2col: 3 row-shifted copies of the input per batch ----------
    for b in range(B):
        for ki in range(3):
            cols1_ref[b * HP1:b * HP1 + H1, ki * LB1:ki * LB1 + WC] = (
                x_ref[b * H + ki:b * H + ki + H1, :])

    # ---- conv1 (both critics stacked on out-channel axis), bf16 MXU, f32 acc
    y1 = _lrelu(jnp.dot(cols1_ref[...].astype(bf16), m1_ref[...],
                        preferred_element_type=f32) + b_ref[0:1, 0:K1])

    # ---- conv2 im2col over conv1's output rows ------------------------------
    for b in range(B):
        for ki in range(3):
            cols2_ref[b * HP2:b * HP2 + H2, ki * LB2:ki * LB2 + K1] = (
                y1[b * HP1 + ki:b * HP1 + ki + H2, :])

    # ---- conv2 (block-diagonal over the two critics) + LeakyReLU ------------
    seq = _lrelu(jnp.dot(cols2_ref[...].astype(bf16), m2_ref[...],
                         preferred_element_type=f32) + b_ref[1:2, 0:NQ])

    # ---- GRU: hoist input projections for all steps/gates/critics -----------
    # bias row 2 already holds [b_ir+b_hr | b_iz+b_hz | b_in] (r/z hidden biases folded).
    xp_ref[...] = (jnp.dot(seq.astype(bf16), ws_ref[r_wi:r_wi + 2 * F, 0:G],
                           preferred_element_type=f32) + b_ref[2:3, 0:G])

    wh = ws_ref[r_wh:r_wh + Hd2, 0:G]                       # bf16, loop-invariant
    bhn = jnp.broadcast_to(b_ref[3:4, 0:Hd2], (B, Hd2))     # only n-gate hidden bias

    # TODO(synk): could hold `wh` in MXU weight registers across the 12 steps via
    # pltpu.matmul_push_rhs / matmul_acc_lhs / matmul_pop; kept jnp.dot for robustness.
    h = jnp.zeros((B, Hd2), f32)                            # [h_critic1 | h_critic2]
    for t in range(T):                                      # static trip count, unrolled
        xp_t = xp_ref[pl.ds(t, B, stride=HP2), :]           # rows {t, HP2+t, ...}
        hp = jnp.dot(h.astype(bf16), wh, preferred_element_type=f32)
        rz = jax.nn.sigmoid(xp_t[:, 0:2 * Hd2] + hp[:, 0:2 * Hd2])  # r,z in one EUP pass
        r = rz[:, 0:Hd2]
        z = rz[:, Hd2:2 * Hd2]
        n = jnp.tanh(xp_t[:, 2 * Hd2:3 * Hd2] + r * (hp[:, 2 * Hd2:3 * Hd2] + bhn))
        h = (1.0 - z) * n + z * h
    h = _lrelu(h)

    # ---- fc1 / fc2 heads (split-weight sums instead of concatenation) -------
    w_bf = wa_ref[:, 0:Hd].astype(bf16)
    a_bf = wa_ref[:, Hd:Hd2].astype(bf16)
    fC = ws_ref[r_fh:r_fh + Hd2, 0:Hd2 + 2]      # cols [0:Hd2) = fc1 h-part, [Hd2:Hd2+2) = fc2 z1-part
    fD = ws_ref[r_fw:r_fw + Hd, 0:Hd2 + 2]       # cols [0:Hd2) = fc1 w-part, [Hd2:Hd2+2) = fc2 a-part
    z1 = _lrelu(jnp.dot(h.astype(bf16), fC[:, 0:Hd2], preferred_element_type=f32)
                + jnp.dot(w_bf, fD[:, 0:Hd2], preferred_element_type=f32)
                + b_ref[4:5, 0:Hd2])
    q = _lrelu(jnp.dot(z1.astype(bf16), fC[:, Hd2:Hd2 + 2], preferred_element_type=f32)
               + jnp.dot(a_bf, fD[:, Hd2:Hd2 + 2], preferred_element_type=f32)
               + b_ref[5:6, 0:2])
    o_ref[...] = q                                # (B, 2) = [q1 | q2]


# ---------------------------------------------------------------------------
# Host-side, one-time parameter packing (4 tensors: m1, m2, ws, bias).
# ---------------------------------------------------------------------------
def pack_double_critic_params(p1, p2, H, W):
    f32 = np.float32
    c1w = np.concatenate([np.asarray(p1["c1w"]), np.asarray(p2["c1w"])], axis=-1)
    C, O1t = c1w.shape[2], c1w.shape[3]
    O1 = O1t // 2
    H1, W1 = H - 2, W - 2
    H2, W2 = H1 - 2, W1 - 2
    Hd = np.asarray(p1["whr"]).shape[0]
    F = W2
    K1 = W1 * O1t                    # conv1 output row width
    NQ = 2 * W2                      # conv2 output row width
    G = 6 * Hd                       # packed gate width [r1 r2 z1 z2 n1 n2]
    Hd2 = 2 * Hd
    LB1 = _round_up(W * C, 128)      # 128-aligned lane-block stride (conv1 im2col)
    LB2 = _round_up(K1, 128)         # 128-aligned lane-block stride (conv2 im2col)

    # conv1 as a Toeplitz matmul: rows (ki, in col, in chan), cols (out col, out chan).
    m1 = np.zeros((3 * LB1, K1), f32)
    for ki in range(3):
        for kj in range(3):
            for j in range(W1):
                r0 = ki * LB1 + (j + kj) * C
                m1[r0:r0 + C, j * O1t:(j + 1) * O1t] = c1w[ki, kj]

    # conv2: rows (ki, in col, stacked chan), cols (critic, out col); block-diag over critics.
    m2 = np.zeros((3 * LB2, NQ), f32)
    for qi, p in enumerate((p1, p2)):
        c2w = np.asarray(p["c2w"])[..., 0]            # (3, 3, O1)
        for ki in range(3):
            for kj in range(3):
                for j in range(W2):
                    r0 = ki * LB2 + (j + kj) * O1t + qi * O1
                    m2[r0:r0 + O1, qi * W2 + j] = c2w[ki, kj]

    # GRU, both critics block-diagonal; gate column order [r1 r2 z1 z2 n1 n2].
    # Fold the r/z halves of the hidden bias into the hoisted input bias.
    wi = np.zeros((2 * F, G), f32)
    wh = np.zeros((Hd2, G), f32)
    bx = np.zeros((G,), f32)
    bhn = np.zeros((Hd2,), f32)
    for qi, p in enumerate((p1, p2)):
        for g, (wn, hn, ibn, hbn) in enumerate((("wir", "whr", "bir", "bhr"),
                                                ("wiz", "whz", "biz", "bhz"),
                                                ("win", "whn", "bin", "bhn"))):
            c0 = g * Hd2 + qi * Hd
            wi[qi * F:(qi + 1) * F, c0:c0 + Hd] = np.asarray(p[wn])
            wh[qi * Hd:(qi + 1) * Hd, c0:c0 + Hd] = np.asarray(p[hn])
            if g < 2:
                bx[c0:c0 + Hd] = np.asarray(p[ibn]) + np.asarray(p[hbn])
            else:
                bx[c0:c0 + Hd] = np.asarray(p[ibn])
                bhn[qi * Hd:(qi + 1) * Hd] = np.asarray(p[hbn])

    # fc heads: rows [h part (2*Hd, block-diag) ; shared-input part (Hd)].
    f1 = np.zeros((3 * Hd, Hd2), f32)
    f2 = np.zeros((3 * Hd, 2), f32)
    f1b = np.zeros((Hd2,), f32)
    f2b = np.zeros((2,), f32)
    for qi, p in enumerate((p1, p2)):
        f1[qi * Hd:(qi + 1) * Hd, qi * Hd:(qi + 1) * Hd] = np.asarray(p["f1wa"])
        f1[Hd2:, qi * Hd:(qi + 1) * Hd] = np.asarray(p["f1wb"])
        f1b[qi * Hd:(qi + 1) * Hd] = np.asarray(p["f1b"])
        f2[qi * Hd:(qi + 1) * Hd, qi] = np.asarray(p["f2wa"])[:, 0]
        f2[Hd2:, qi] = np.asarray(p["f2wb"])[:, 0]
        f2b[qi] = np.asarray(p["f2b"])[0]

    # All non-conv weights packed into one bf16 tensor.
    r_wi, r_wh, r_fh, r_fw, ws_rows = _ws_layout(F, Hd)
    ws = np.zeros((ws_rows, max(G, Hd2 + 2)), f32)
    ws[r_wi:r_wi + 2 * F, 0:G] = wi
    ws[r_wh:r_wh + Hd2, 0:G] = wh
    ws[r_fh:r_fh + Hd2, 0:Hd2] = f1[0:Hd2]
    ws[r_fh:r_fh + Hd2, Hd2:Hd2 + 2] = f2[0:Hd2]
    ws[r_fw:r_fw + Hd, 0:Hd2] = f1[Hd2:]
    ws[r_fw:r_fw + Hd, Hd2:Hd2 + 2] = f2[Hd2:]

    # conv biases expanded to the output-row lane layouts.
    b1_row = np.tile(np.concatenate([np.asarray(p1["c1b"]),
                                     np.asarray(p2["c1b"])]), W1).astype(f32)
    b2_row = np.repeat(np.array([np.asarray(p1["c2b"])[0],
                                 np.asarray(p2["c2b"])[0]], f32), W2)

    bw = max(K1, NQ, G, Hd2, 2)
    bias = np.zeros((6, bw), f32)
    bias[0, :K1] = b1_row
    bias[1, :NQ] = b2_row
    bias[2, :G] = bx
    bias[3, :Hd2] = bhn
    bias[4, :Hd2] = f1b
    bias[5, :2] = f2b

    bf16 = jnp.bfloat16
    return dict(m1=jnp.asarray(m1, dtype=bf16), m2=jnp.asarray(m2, dtype=bf16),
                ws=jnp.asarray(ws, dtype=bf16), bias=jnp.asarray(bias))


# ---------------------------------------------------------------------------
# JIT'd wrapper: one pallas_call for the whole double critic.
# ---------------------------------------------------------------------------
@jax.jit
def double_cnn_gru_critic(packed, x_nchw, w, action):
    if x_nchw.ndim == 3:                          # unbatched path from the module
        x_nchw, w, action = x_nchw[None], w[None], action[None]
    B, C, H, W = x_nchw.shape
    Hd = w.shape[-1]
    x2d = jnp.transpose(x_nchw, (0, 2, 3, 1)).reshape(B * H, W * C)
    wa = jnp.concatenate([w, action], axis=-1)    # one DMA for both small vectors

    H1, H2 = H - 2, H - 4
    HP1, HP2 = _round_up(H1, 8), _round_up(H2, 8)
    LB1 = packed["m1"].shape[0] // 3
    LB2 = packed["m2"].shape[0] // 3
    G = 6 * Hd

    kernel = functools.partial(_double_critic_kernel, B=B, H=H, W=W, Hd=Hd)
    vm = pl.BlockSpec(memory_space=pltpu.MemorySpace.VMEM)
    # TODO(synk): for large training batches add a ("parallel",) batch grid so both v7x
    # TensorCores get work; grid-less is the right shape for B=2 inference.
    out = pl.pallas_call(
        kernel,
        out_shape=jax.ShapeDtypeStruct((B, 2), jnp.float32),
        in_specs=[vm] * 6,
        out_specs=vm,
        scratch_shapes=[pltpu.VMEM((B * HP1, 3 * LB1), jnp.float32),
                        pltpu.VMEM((B * HP2, 3 * LB2), jnp.float32),
                        pltpu.VMEM((B * HP2, G), jnp.float32)],
    )(x2d, wa, packed["m1"], packed["m2"], packed["ws"], packed["bias"])
    return out[:, 0:1], out[:, 1:2]


# ---------------------------------------------------------------------------
# Deterministic synthetic per-critic parameters (kaiming-style weights,
# small uniform biases).
# ---------------------------------------------------------------------------
def _kaiming_std(fan_in, a=NEG_SLOPE):
    return math.sqrt(2.0 / (1.0 + a * a)) / math.sqrt(fan_in)


def init_critic_params(key, in_channels, num_stocks):
    C, O1 = in_channels, 2 * in_channels
    F, Hd = num_stocks - 4, num_stocks + 1
    ks = jax.random.split(key, 22)

    def kn(k, shape, fan_in):
        return _kaiming_std(fan_in) * jax.random.normal(k, shape, jnp.float32)

    def ub(k, shape, fan_in):
        b = 1.0 / math.sqrt(fan_in)
        return jax.random.uniform(k, shape, jnp.float32, -b, b)

    # TODO(synk): the PyTorch GRU init loop (named_modules on nn.GRU) is a no-op, so a
    # real module keeps PyTorch's default uniform GRU init; synthetic init stands in.
    return {
        "c1w": kn(ks[0], (3, 3, C, O1), 9 * C),  "c1b": ub(ks[1], (O1,), 9 * C),
        "c2w": kn(ks[2], (3, 3, O1, 1), 9 * O1), "c2b": ub(ks[3], (1,), 9 * O1),
        "wir": kn(ks[4], (F, Hd), F), "wiz": kn(ks[5], (F, Hd), F),
        "win": kn(ks[6], (F, Hd), F),
        "whr": kn(ks[7], (Hd, Hd), Hd), "whz": kn(ks[8], (Hd, Hd), Hd),
        "whn": kn(ks[9], (Hd, Hd), Hd),
        "bir": ub(ks[10], (Hd,), Hd), "biz": ub(ks[11], (Hd,), Hd),
        "bin": ub(ks[12], (Hd,), Hd),
        "bhr": ub(ks[13], (Hd,), Hd), "bhz": ub(ks[14], (Hd,), Hd),
        "bhn": ub(ks[15], (Hd,), Hd),
        "f1wa": kn(ks[16], (Hd, Hd), 2 * Hd), "f1wb": kn(ks[17], (Hd, Hd), 2 * Hd),
        "f1b": ub(ks[18], (Hd,), 2 * Hd),
        "f2wa": kn(ks[19], (Hd, 1), 2 * Hd), "f2wb": kn(ks[20], (Hd, 1), 2 * Hd),
        "f2b": ub(ks[21], (1,), 2 * Hd),
    }


# ---------------------------------------------------------------------------
# Pure-JAX per-critic reference.  It mirrors the kernel's precision policy
# (bf16 matmul/conv operands, f32 accumulation and activations) so the check
# validates structure/packing without precision-induced flakiness.
# ---------------------------------------------------------------------------
def critic_reference(p, x_nhwc, w, action):
    f32, bf16 = jnp.float32, jnp.bfloat16

    def bdot(a, b):
        return jnp.dot(a.astype(bf16), b.astype(bf16), preferred_element_type=f32)

    y = jax.lax.conv_general_dilated(
        x_nhwc.astype(bf16), p["c1w"].astype(bf16), (1, 1), "VALID",
        dimension_numbers=("NHWC", "HWIO", "NHWC"), preferred_element_type=f32)
    y = _lrelu(y + p["c1b"])
    y = jax.lax.conv_general_dilated(
        y.astype(bf16), p["c2w"].astype(bf16), (1, 1), "VALID",
        dimension_numbers=("NHWC", "HWIO", "NHWC"), preferred_element_type=f32)
    y = _lrelu(y + p["c2b"])
    seq = y[..., 0]                               # (B, T, F)
    B, T, _ = seq.shape
    Hd = p["whr"].shape[0]
    h = jnp.zeros((B, Hd), f32)
    for t in range(T):
        x_t = seq[:, t, :]
        r = jax.nn.sigmoid(bdot(x_t, p["wir"]) + p["bir"] + bdot(h, p["whr"]) + p["bhr"])
        z = jax.nn.sigmoid(bdot(x_t, p["wiz"]) + p["biz"] + bdot(h, p["whz"]) + p["bhz"])
        n = jnp.tanh(bdot(x_t, p["win"]) + p["bin"] + r * (bdot(h, p["whn"]) + p["bhn"]))
        h = (1.0 - z) * n + z * h
    h = _lrelu(h)
    z1 = _lrelu(bdot(h, p["f1wa"]) + bdot(w, p["f1wb"]) + p["f1b"])
    return _lrelu(bdot(z1, p["f2wa"]) + bdot(action, p["f2wb"]) + p["f2b"])


if __name__ == "__main__":
    in_channels, num_stocks = 4, 16
    # Width must equal num_stocks so the conv output feature dim == num_stocks - 4.
    B, H, W = 2, 16, num_stocks

    key = jax.random.PRNGKey(0)
    kx, kw, ka, k1, k2 = jax.random.split(key, 5)
    x = jax.random.normal(kx, (B, in_channels, H, W), jnp.float32)   # NCHW (PyTorch)
    w = jax.random.normal(kw, (B, num_stocks + 1), jnp.float32)
    action = jax.random.normal(ka, (B, num_stocks + 1), jnp.float32)

    p1 = init_critic_params(k1, in_channels, num_stocks)
    p2 = init_critic_params(k2, in_channels, num_stocks)
    packed = pack_double_critic_params(p1, p2, H, W)

    q1, q2 = double_cnn_gru_critic(packed, x, w, action)
    jax.block_until_ready((q1, q2))
    assert q1.shape == (B, 1) and q2.shape == (B, 1)
    assert bool(jnp.all(jnp.isfinite(q1))) and bool(jnp.all(jnp.isfinite(q2)))

    # Sanity check against the pure-JAX per-critic reference (same bf16 matmul policy).
    x_nhwc = jnp.transpose(x, (0, 2, 3, 1))
    r1 = critic_reference(p1, x_nhwc, w, action)
    r2 = critic_reference(p2, x_nhwc, w, action)
    assert jnp.allclose(q1, r1, rtol=2e-2, atol=2e-2), (np.asarray(q1), np.asarray(r1))
    assert jnp.allclose(q2, r2, rtol=2e-2, atol=2e-2), (np.asarray(q2), np.asarray(r2))

    print("KERNEL_OK")
</pallas_src>

<mosaic_0001>
module attributes {stable_mosaic.version = 11 : i64} {
  func.func @_double_critic_kernel(%arg0: memref<32x64xf32, #tpu.memory_space<vmem>>, %arg1: memref<2x34xf32, #tpu.memory_space<vmem>>, %arg2: memref<384x224xbf16, #tpu.memory_space<vmem>>, %arg3: memref<768x24xbf16, #tpu.memory_space<vmem>>, %arg4: memref<160x102xbf16, #tpu.memory_space<vmem>>, %arg5: memref<6x224xf32, #tpu.memory_space<vmem>>, %arg6: memref<2x2xf32, #tpu.memory_space<vmem>>, %arg7: memref<32x384xf32, #tpu.memory_space<vmem>>, %arg8: memref<32x768xf32, #tpu.memory_space<vmem>>, %arg9: memref<32x102xf32, #tpu.memory_space<vmem>>) attributes {dimension_semantics = [], scalar_prefetch = 0 : i64, scratch_operands = 3 : i64, tpu.core_type = #tpu.core_type<tc>} {
    %cst = arith.constant 0.000000e+00 : f32
    %0 = vector.broadcast %cst : f32 to vector<32x384xf32>
    %c0 = arith.constant 0 : index
    %c0_0 = arith.constant 0 : index
    %1 = vector.load %arg7[%c0, %c0_0] : memref<32x384xf32, #tpu.memory_space<vmem>>, vector<32x384xf32>
    tpu.vector_store %arg7[%c0, %c0_0], %0 {strides = array<i32>} : memref<32x384xf32, #tpu.memory_space<vmem>>, vector<32x384xf32>,
    %cst_1 = arith.constant 0.000000e+00 : f32
    %2 = vector.broadcast %cst_1 : f32 to vector<32x768xf32>
    %c0_2 = arith.constant 0 : index
    %c0_3 = arith.constant 0 : index
    %3 = vector.load %arg8[%c0_2, %c0_3] : memref<32x768xf32, #tpu.memory_space<vmem>>, vector<32x768xf32>
    tpu.vector_store %arg8[%c0_2, %c0_3], %2 {strides = array<i32>} : memref<32x768xf32, #tpu.memory_space<vmem>>, vector<32x768xf32>,
    %c0_4 = arith.constant 0 : index
    %c0_5 = arith.constant 0 : index
    %4 = vector.load %arg0[%c0_4, %c0_5] : memref<32x64xf32, #tpu.memory_space<vmem>>, vector<14x64xf32>
    %c0_6 = arith.constant 0 : index
    %c0_7 = arith.constant 0 : index
    %5 = vector.load %arg7[%c0_6, %c0_7] : memref<32x384xf32, #tpu.memory_space<vmem>>, vector<14x64xf32>
    tpu.vector_store %arg7[%c0_6, %c0_7], %4 {strides = array<i32>} : memref<32x384xf32, #tpu.memory_space<vmem>>, vector<14x64xf32>,
    %c1 = arith.constant 1 : index
    %c0_8 = arith.constant 0 : index
    %6 = vector.load %arg0[%c1, %c0_8] : memref<32x64xf32, #tpu.memory_space<vmem>>, vector<14x64xf32>
    %c0_9 = arith.constant 0 : index
    %c128 = arith.constant 128 : index
    %7 = vector.load %arg7[%c0_9, %c128] : memref<32x384xf32, #tpu.memory_space<vmem>>, vector<14x64xf32>
    tpu.vector_store %arg7[%c0_9, %c128], %6 {strides = array<i32>} : memref<32x384xf32, #tpu.memory_space<vmem>>, vector<14x64xf32>,
    %c2 = arith.constant 2 : index
    %c0_10 = arith.constant 0 : index
    %8 = vector.load %arg0[%c2, %c0_10] : memref<32x64xf32, #tpu.memory_space<vmem>>, vector<14x64xf32>
    %c0_11 = arith.constant 0 : index
    %c256 = arith.constant 256 : index
    %9 = vector.load %arg7[%c0_11, %c256] : memref<32x384xf32, #tpu.memory_space<vmem>>, vector<14x64xf32>
    tpu.vector_store %arg7[%c0_11, %c256], %8 {strides = array<i32>} : memref<32x384xf32, #tpu.memory_space<vmem>>, vector<14x64xf32>,
    %c16 = arith.constant 16 : index
    %c0_12 = arith.constant 0 : index
    %10 = vector.load %arg0[%c16, %c0_12] : memref<32x64xf32, #tpu.memory_space<vmem>>, vector<14x64xf32>
    %c16_13 = arith.constant 16 : index
    %c0_14 = arith.constant 0 : index
    %11 = vector.load %arg7[%c16_13, %c0_14] : memref<32x384xf32, #tpu.memory_space<vmem>>, vector<14x64xf32>
    tpu.vector_store %arg7[%c16_13, %c0_14], %10 {strides = array<i32>} : memref<32x384xf32, #tpu.memory_space<vmem>>, vector<14x64xf32>,
    %c17 = arith.constant 17 : index
    %c0_15 = arith.constant 0 : index
    %12 = vector.load %arg0[%c17, %c0_15] : memref<32x64xf32, #tpu.memory_space<vmem>>, vector<14x64xf32>
    %c16_16 = arith.constant 16 : index
    %c128_17 = arith.constant 128 : index
    %13 = vector.load %arg7[%c16_16, %c128_17] : memref<32x384xf32, #tpu.memory_space<vmem>>, vector<14x64xf32>
    tpu.vector_store %arg7[%c16_16, %c128_17], %12 {strides = array<i32>} : memref<32x384xf32, #tpu.memory_space<vmem>>, vector<14x64xf32>,
    %c18 = arith.constant 18 : index
    %c0_18 = arith.constant 0 : index
    %14 = vector.load %arg0[%c18, %c0_18] : memref<32x64xf32, #tpu.memory_space<vmem>>, vector<14x64xf32>
    %c16_19 = arith.constant 16 : index
    %c256_20 = arith.constant 256 : index
    %15 = vector.load %arg7[%c16_19, %c256_20] : memref<32x384xf32, #tpu.memory_space<vmem>>, vector<14x64xf32>
    tpu.vector_store %arg7[%c16_19, %c256_20], %14 {strides = array<i32>} : memref<32x384xf32, #tpu.memory_space<vmem>>, vector<14x64xf32>,
    %c0_21 = arith.constant 0 : index
    %c0_22 = arith.constant 0 : index
    %16 = vector.load %arg7[%c0_21, %c0_22] : memref<32x384xf32, #tpu.memory_space<vmem>>, vector<32x384xf32>
    %17 = arith.truncf %16 : vector<32x384xf32> to vector<32x384xbf16>
    %c0_23 = arith.constant 0 : index
    %c0_24 = arith.constant 0 : index
    %18 = vector.load %arg2[%c0_23, %c0_24] : memref<384x224xbf16, #tpu.memory_space<vmem>>, vector<384x224xbf16>
    %cst_25 = arith.constant dense<0.000000e+00> : vector<32x224xf32>
    %19 = tpu.matmul %17, %18, %cst_25 {dimension_numbers = #tpu.dot_dimension_numbers<[1], [0], [0], [1], [0, 0, 1, 1], [], []>} : vector<32x384xbf16>, vector<384x224xbf16>, vector<32x224xf32> -> vector<32x224xf32>
    %c0_26 = arith.constant 0 : index
    %c0_27 = arith.constant 0 : index
    %20 = vector.load %arg5[%c0_26, %c0_27] : memref<6x224xf32, #tpu.memory_space<vmem>>, vector<1x224xf32>
    %21 = vector.broadcast %20 : vector<1x224xf32> to vector<32x224xf32>
    %22 = arith.addf %19, %21 : vector<32x224xf32>
    %cst_28 = arith.constant 0.000000e+00 : f32
    %23 = vector.broadcast %cst_28 : f32 to vector<32x224xf32>
    %24 = arith.cmpf ogt, %22, %23 : vector<32x224xf32>
    %cst_29 = arith.constant 0.00999999977 : f32
    %25 = vector.broadcast %cst_29 : f32 to vector<32x224xf32>
    %26 = arith.mulf %25, %22 : vector<32x224xf32>
    %27 = arith.select %24, %22, %26 : vector<32x224xi1>, vector<32x224xf32>
    %28 = vector.extract_strided_slice %27 {offsets = [0, 0], sizes = [12, 224], strides = [1, 1]} : vector<32x224xf32> to vector<12x224xf32>
    %c0_30 = arith.constant 0 : index
    %c0_31 = arith.constant 0 : index
    %29 = vector.load %arg8[%c0_30, %c0_31] : memref<32x768xf32, #tpu.memory_space<vmem>>, vector<12x224xf32>
    tpu.vector_store %arg8[%c0_30, %c0_31], %28 {strides = array<i32>} : memref<32x768xf32, #tpu.memory_space<vmem>>, vector<12x224xf32>,
    %30 = vector.extract_strided_slice %27 {offsets = [1, 0], sizes = [12, 224], strides = [1, 1]} : vector<32x224xf32> to vector<12x224xf32>
    %c0_32 = arith.constant 0 : index
    %c256_33 = arith.constant 256 : index
    %31 = vector.load %arg8[%c0_32, %c256_33] : memref<32x768xf32, #tpu.memory_space<vmem>>, vector<12x224xf32>
    tpu.vector_store %arg8[%c0_32, %c256_33], %30 {strides = array<i32>} : memref<32x768xf32, #tpu.memory_space<vmem>>, vector<12x224xf32>,
    %32 = vector.extract_strided_slice %27 {offsets = [2, 0], sizes = [12, 224], strides = [1, 1]} : vector<32x224xf32> to vector<12x224xf32>
    %c0_34 = arith.constant 0 : index
    %c512 = arith.constant 512 : index
    %33 = vector.load %arg8[%c0_34, %c512] : memref<32x768xf32, #tpu.memory_space<vmem>>, vector<12x224xf32>
    tpu.vector_store %arg8[%c0_34, %c512], %32 {strides = array<i32>} : memref<32x768xf32, #tpu.memory_space<vmem>>, vector<12x224xf32>,
    %34 = vector.extract_strided_slice %27 {offsets = [16, 0], sizes = [12, 224], strides = [1, 1]} : vector<32x224xf32> to vector<12x224xf32>
    %c16_35 = arith.constant 16 : index
    %c0_36 = arith.constant 0 : index
    %35 = vector.load %arg8[%c16_35, %c0_36] : memref<32x768xf32, #tpu.memory_space<vmem>>, vector<12x224xf32>
    tpu.vector_store %arg8[%c16_35, %c0_36], %34 {strides = array<i32>} : memref<32x768xf32, #tpu.memory_space<vmem>>, vector<12x224xf32>,
    %36 = vector.extract_strided_slice %27 {offsets = [17, 0], sizes = [12, 224], strides = [1, 1]} : vector<32x224xf32> to vector<12x224xf32>
    %c16_37 = arith.constant 16 : index
    %c256_38 = arith.constant 256 : index
    %37 = vector.load %arg8[%c16_37, %c256_38] : memref<32x768xf32, #tpu.memory_space<vmem>>, vector<12x224xf32>
    tpu.vector_store %arg8[%c16_37, %c256_38], %36 {strides = array<i32>} : memref<32x768xf32, #tpu.memory_space<vmem>>, vector<12x224xf32>,
    %38 = vector.extract_strided_slice %27 {offsets = [18, 0], sizes = [12, 224], strides = [1, 1]} : vector<32x224xf32> to vector<12x224xf32>
    %c16_39 = arith.constant 16 : index
    %c512_40 = arith.constant 512 : index
    %39 = vector.load %arg8[%c16_39, %c512_40] : memref<32x768xf32, #tpu.memory_space<vmem>>, vector<12x224xf32>
    tpu.vector_store %arg8[%c16_39, %c512_40], %38 {strides = array<i32>} : memref<32x768xf32, #tpu.memory_space<vmem>>, vector<12x224xf32>,
    %c0_41 = arith.constant 0 : index
    %c0_42 = arith.constant 0 : index
    %40 = vector.load %arg8[%c0_41, %c0_42] : memref<32x768xf32, #tpu.memory_space<vmem>>, vector<32x768xf32>
    %41 = arith.truncf %40 : vector<32x768xf32> to vector<32x768xbf16>
    %c0_43 = arith.constant 0 : index
    %c0_44 = arith.constant 0 : index
    %42 = vector.load %arg3[%c0_43, %c0_44] : memref<768x24xbf16, #tpu.memory_space<vmem>>, vector<768x24xbf16>
    %cst_45 = arith.constant dense<0.000000e+00> : vector<32x24xf32>
    %43 = tpu.matmul %41, %42, %cst_45 {dimension_numbers = #tpu.dot_dimension_numbers<[1], [0], [0], [1], [0, 0, 1, 1], [], []>} : vector<32x768xbf16>, vector<768x24xbf16>, vector<32x24xf32> -> vector<32x24xf32>
    %c1_46 = arith.constant 1 : index
    %c0_47 = arith.constant 0 : index
    %44 = vector.load %arg5[%c1_46, %c0_47] : memref<6x224xf32, #tpu.memory_space<vmem>>, vector<1x24xf32>
    %45 = vector.broadcast %44 : vector<1x24xf32> to vector<32x24xf32>
    %46 = arith.addf %43, %45 : vector<32x24xf32>
    %cst_48 = arith.constant 0.000000e+00 : f32
    %47 = vector.broadcast %cst_48 : f32 to vector<32x24xf32>
    %48 = arith.cmpf ogt, %46, %47 : vector<32x24xf32>
    %cst_49 = arith.constant 0.00999999977 : f32
    %49 = vector.broadcast %cst_49 : f32 to vector<32x24xf32>
    %50 = arith.mulf %49, %46 : vector<32x24xf32>
    %51 = arith.select %48, %46, %50 : vector<32x24xi1>, vector<32x24xf32>
    %52 = arith.truncf %51 : vector<32x24xf32> to vector<32x24xbf16>
    %c0_50 = arith.constant 0 : index
    %c0_51 = arith.constant 0 : index
    %53 = vector.load %arg4[%c0_50, %c0_51] : memref<160x102xbf16, #tpu.memory_space<vmem>>, vector<24x102xbf16>
    %cst_52 = arith.constant dense<0.000000e+00> : vector<32x102xf32>
    %54 = tpu.matmul %52, %53, %cst_52 {dimension_numbers = #tpu.dot_dimension_numbers<[1], [0], [0], [1], [0, 0, 1, 1], [], []>} : vector<32x24xbf16>, vector<24x102xbf16>, vector<32x102xf32> -> vector<32x102xf32>
    %c2_53 = arith.constant 2 : index
    %c0_54 = arith.constant 0 : index
    %55 = vector.load %arg5[%c2_53, %c0_54] : memref<6x224xf32, #tpu.memory_space<vmem>>, vector<1x102xf32>
    %56 = vector.broadcast %55 : vector<1x102xf32> to vector<32x102xf32>
    %57 = arith.addf %54, %56 : vector<32x102xf32>
    %c0_55 = arith.constant 0 : index
    %c0_56 = arith.constant 0 : index
    %58 = vector.load %arg9[%c0_55, %c0_56] : memref<32x102xf32, #tpu.memory_space<vmem>>, vector<32x102xf32>
    tpu.vector_store %arg9[%c0_55, %c0_56], %57 {strides = array<i32>} : memref<32x102xf32, #tpu.memory_space<vmem>>, vector<32x102xf32>,
    %c32 = arith.constant 32 : index
    %c0_57 = arith.constant 0 : index
    %59 = vector.load %arg4[%c32, %c0_57] : memref<160x102xbf16, #tpu.memory_space<vmem>>, vector<34x102xbf16>
    %c3 = arith.constant 3 : index
    %c0_58 = arith.constant 0 : index
    %60 = vector.load %arg5[%c3, %c0_58] : memref<6x224xf32, #tpu.memory_space<vmem>>, vector<1x34xf32>
    %61 = vector.shape_cast %60 : vector<1x34xf32> to vector<1x34xf32>
    %62 = vector.broadcast %61 : vector<1x34xf32> to vector<2x34xf32>
    %cst_59 = arith.constant 0.000000e+00 : f32
    %63 = vector.broadcast %cst_59 : f32 to vector<2x34xf32>
    %c0_60 = arith.constant 0 : index
    %c0_61 = arith.constant 0 : index
    %64 = tpu.strided_load %arg9[%c0_60, %c0_61] {strides = array<i32: 16, 1>} : memref<32x102xf32, #tpu.memory_space<vmem>>, vector<2x102xf32>
    %65 = arith.truncf %63 : vector<2x34xf32> to vector<2x34xbf16>
    %cst_62 = arith.constant dense<0.000000e+00> : vector<2x102xf32>
    %66 = tpu.matmul %65, %59, %cst_62 {dimension_numbers = #tpu.dot_dimension_numbers<[1], [0], [0], [1], [0, 0, 1, 1], [], []>} : vector<2x34xbf16>, vector<34x102xbf16>, vector<2x102xf32> -> vector<2x102xf32>
    %67 = vector.extract_strided_slice %64 {offsets = [0, 0], sizes = [2, 68], strides = [1, 1]} : vector<2x102xf32> to vector<2x68xf32>
    %68 = vector.extract_strided_slice %66 {offsets = [0, 0], sizes = [2, 68], strides = [1, 1]} : vector<2x102xf32> to vector<2x68xf32>
    %69 = arith.addf %67, %68 : vector<2x68xf32>
    %70 = arith.negf %69 : vector<2x68xf32>
    %71 = math.exp %70 : vector<2x68xf32>
    %cst_63 = arith.constant 1.000000e+00 : f32
    %72 = vector.broadcast %cst_63 : f32 to vector<2x68xf32>
    %73 = arith.addf %72, %71 : vector<2x68xf32>
    %74 = arith.divf %72, %73 : vector<2x68xf32>
    %75 = vector.extract_strided_slice %74 {offsets = [0, 0], sizes = [2, 34], strides = [1, 1]} : vector<2x68xf32> to vector<2x34xf32>
    %76 = vector.extract_strided_slice %74 {offsets = [0, 34], sizes = [2, 34], strides = [1, 1]} : vector<2x68xf32> to vector<2x34xf32>
    %77 = vector.extract_strided_slice %64 {offsets = [0, 68], sizes = [2, 34], strides = [1, 1]} : vector<2x102xf32> to vector<2x34xf32>
    %78 = vector.extract_strided_slice %66 {offsets = [0, 68], sizes = [2, 34], strides = [1, 1]} : vector<2x102xf32> to vector<2x34xf32>
    %79 = arith.addf %78, %62 : vector<2x34xf32>
    %80 = arith.mulf %75, %79 : vector<2x34xf32>
    %81 = arith.addf %77, %80 : vector<2x34xf32>
    %82 = math.tanh %81 : vector<2x34xf32>
    %cst_64 = arith.constant 1.000000e+00 : f32
    %83 = vector.broadcast %cst_64 : f32 to vector<2x34xf32>
    %84 = arith.subf %83, %76 : vector<2x34xf32>
    %85 = arith.mulf %84, %82 : vector<2x34xf32>
    %86 = arith.mulf %76, %63 : vector<2x34xf32>
    %87 = arith.addf %85, %86 : vector<2x34xf32>
    %c1_65 = arith.constant 1 : index
    %c0_66 = arith.constant 0 : index
    %88 = tpu.strided_load %arg9[%c1_65, %c0_66] {strides = array<i32: 16, 1>} : memref<32x102xf32, #tpu.memory_space<vmem>>, vector<2x102xf32>
    %89 = arith.truncf %87 : vector<2x34xf32> to vector<2x34xbf16>
    %cst_67 = arith.constant dense<0.000000e+00> : vector<2x102xf32>
    %90 = tpu.matmul %89, %59, %cst_67 {dimension_numbers = #tpu.dot_dimension_numbers<[1], [0], [0], [1], [0, 0, 1, 1], [], []>} : vector<2x34xbf16>, vector<34x102xbf16>, vector<2x102xf32> -> vector<2x102xf32>
    %91 = vector.extract_strided_slice %88 {offsets = [0, 0], sizes = [2, 68], strides = [1, 1]} : vector<2x102xf32> to vector<2x68xf32>
    %92 = vector.extract_strided_slice %90 {offsets = [0, 0], sizes = [2, 68], strides = [1, 1]} : vector<2x102xf32> to vector<2x68xf32>
    %93 = arith.addf %91, %92 : vector<2x68xf32>
    %94 = arith.negf %93 : vector<2x68xf32>
    %95 = math.exp %94 : vector<2x68xf32>
    %cst_68 = arith.constant 1.000000e+00 : f32
    %96 = vector.broadcast %cst_68 : f32 to vector<2x68xf32>
    %97 = arith.addf %96, %95 : vector<2x68xf32>
    %98 = arith.divf %96, %97 : vector<2x68xf32>
    %99 = vector.extract_strided_slice %98 {offsets = [0, 0], sizes = [2, 34], strides = [1, 1]} : vector<2x68xf32> to vector<2x34xf32>
    %100 = vector.extract_strided_slice %98 {offsets = [0, 34], sizes = [2, 34], strides = [1, 1]} : vector<2x68xf32> to vector<2x34xf32>
    %101 = vector.extract_strided_slice %88 {offsets = [0, 68], sizes = [2, 34], strides = [1, 1]} : vector<2x102xf32> to vector<2x34xf32>
    %102 = vector.extract_strided_slice %90 {offsets = [0, 68], sizes = [2, 34], strides = [1, 1]} : vector<2x102xf32> to vector<2x34xf32>
    %103 = arith.addf %102, %62 : vector<2x34xf32>
    %104 = arith.mulf %99, %103 : vector<2x34xf32>
    %105 = arith.addf %101, %104 : vector<2x34xf32>
    %106 = math.tanh %105 : vector<2x34xf32>
    %cst_69 = arith.constant 1.000000e+00 : f32
    %107 = vector.broadcast %cst_69 : f32 to vector<2x34xf32>
    %108 = arith.subf %107, %100 : vector<2x34xf32>
    %109 = arith.mulf %108, %106 : vector<2x34xf32>
    %110 = arith.mulf %100, %87 : vector<2x34xf32>
    %111 = arith.addf %109, %110 : vector<2x34xf32>
    %c2_70 = arith.constant 2 : index
    %c0_71 = arith.constant 0 : index
    %112 = tpu.strided_load %arg9[%c2_70, %c0_71] {strides = array<i32: 16, 1>} : memref<32x102xf32, #tpu.memory_space<vmem>>, vector<2x102xf32>
    %113 = arith.truncf %111 : vector<2x34xf32> to vector<2x34xbf16>
    %cst_72 = arith.constant dense<0.000000e+00> : vector<2x102xf32>
    %114 = tpu.matmul %113, %59, %cst_72 {dimension_numbers = #tpu.dot_dimension_numbers<[1], [0], [0], [1], [0, 0, 1, 1], [], []>} : vector<2x34xbf16>, vector<34x102xbf16>, vector<2x102xf32> -> vector<2x102xf32>
    %115 = vector.extract_strided_slice %112 {offsets = [0, 0], sizes = [2, 68], strides = [1, 1]} : vector<2x102xf32> to vector<2x68xf32>
    %116 = vector.extract_strided_slice %114 {offsets = [0, 0], sizes = [2, 68], strides = [1, 1]} : vector<2x102xf32> to vector<2x68xf32>
    %117 = arith.addf %115, %116 : vector<2x68xf32>
    %118 = arith.negf %117 : vector<2x68xf32>
    %119 = math.exp %118 : vector<2x68xf32>
    %cst_73 = arith.constant 1.000000e+00 : f32
    %120 = vector.broadcast %cst_73 : f32 to vector<2x68xf32>
    %121 = arith.addf %120, %119 : vector<2x68xf32>
    %122 = arith.divf %120, %121 : vector<2x68xf32>
    %123 = vector.extract_strided_slice %122 {offsets = [0, 0], sizes = [2, 34], strides = [1, 1]} : vector<2x68xf32> to vector<2x34xf32>
    %124 = vector.extract_strided_slice %122 {offsets = [0, 34], sizes = [2, 34], strides = [1, 1]} : vector<2x68xf32> to vector<2x34xf32>
    %125 = vector.extract_strided_slice %112 {offsets = [0, 68], sizes = [2, 34], strides = [1, 1]} : vector<2x102xf32> to vector<2x34xf32>
    %126 = vector.extract_strided_slice %114 {offsets = [0, 68], sizes = [2, 34], strides = [1, 1]} : vector<2x102xf32> to vector<2x34xf32>
    %127 = arith.addf %126, %62 : vector<2x34xf32>
    %128 = arith.mulf %123, %127 : vector<2x34xf32>
    %129 = arith.addf %125, %128 : vector<2x34xf32>
    %130 = math.tanh %129 : vector<2x34xf32>
    %cst_74 = arith.constant 1.000000e+00 : f32
    %131 = vector.broadcast %cst_74 : f32 to vector<2x34xf32>
    %132 = arith.subf %131, %124 : vector<2x34xf32>
    %133 = arith.mulf %132, %130 : vector<2x34xf32>
    %134 = arith.mulf %124, %111 : vector<2x34xf32>
    %135 = arith.addf %133, %134 : vector<2x34xf32>
    %c3_75 = arith.constant 3 : index
    %c0_76 = arith.constant 0 : index
    %136 = tpu.strided_load %arg9[%c3_75, %c0_76] {strides = array<i32: 16, 1>} : memref<32x102xf32, #tpu.memory_space<vmem>>, vector<2x102xf32>
    %137 = arith.truncf %135 : vector<2x34xf32> to vector<2x34xbf16>
    %cst_77 = arith.constant dense<0.000000e+00> : vector<2x102xf32>
    %138 = tpu.matmul %137, %59, %cst_77 {dimension_numbers = #tpu.dot_dimension_numbers<[1], [0], [0], [1], [0, 0, 1, 1], [], []>} : vector<2x34xbf16>, vector<34x102xbf16>, vector<2x102xf32> -> vector<2x102xf32>
    %139 = vector.extract_strided_slice %136 {offsets = [0, 0], sizes = [2, 68], strides = [1, 1]} : vector<2x102xf32> to vector<2x68xf32>
    %140 = vector.extract_strided_slice %138 {offsets = [0, 0], sizes = [2, 68], strides = [1, 1]} : vector<2x102xf32> to vector<2x68xf32>
    %141 = arith.addf %139, %140 : vector<2x68xf32>
    %142 = arith.negf %141 : vector<2x68xf32>
    %143 = math.exp %142 : vector<2x68xf32>
    %cst_78 = arith.constant 1.000000e+00 : f32
    %144 = vector.broadcast %cst_78 : f32 to vector<2x68xf32>
    %145 = arith.addf %144, %143 : vector<2x68xf32>
    %146 = arith.divf %144, %145 : vector<2x68xf32>
    %147 = vector.extract_strided_slice %146 {offsets = [0, 0], sizes = [2, 34], strides = [1, 1]} : vector<2x68xf32> to vector<2x34xf32>
    %148 = vector.extract_strided_slice %146 {offsets = [0, 34], sizes = [2, 34], strides = [1, 1]} : vector<2x68xf32> to vector<2x34xf32>
    %149 = vector.extract_strided_slice %136 {offsets = [0, 68], sizes = [2, 34], strides = [1, 1]} : vector<2x102xf32> to vector<2x34xf32>
    %150 = vector.extract_strided_slice %138 {offsets = [0, 68], sizes = [2, 34], strides = [1, 1]} : vector<2x102xf32> to vector<2x34xf32>
    %151 = arith.addf %150, %62 : vector<2x34xf32>
    %152 = arith.mulf %147, %151 : vector<2x34xf32>
    %153 = arith.addf %149, %152 : vector<2x34xf32>
    %154 = math.tanh %153 : vector<2x34xf32>
    %cst_79 = arith.constant 1.000000e+00 : f32
    %155 = vector.broadcast %cst_79 : f32 to vector<2x34xf32>
    %156 = arith.subf %155, %148 : vector<2x34xf32>
    %157 = arith.mulf %156, %154 : vector<2x34xf32>
    %158 = arith.mulf %148, %135 : vector<2x34xf32>
    %159 = arith.addf %157, %158 : vector<2x34xf32>
    %c4 = arith.constant 4 : index
    %c0_80 = arith.constant 0 : index
    %160 = tpu.strided_load %arg9[%c4, %c0_80] {strides = array<i32: 16, 1>} : memref<32x102xf32, #tpu.memory_space<vmem>>, vector<2x102xf32>
    %161 = arith.truncf %159 : vector<2x34xf32> to vector<2x34xbf16>
    %cst_81 = arith.constant dense<0.000000e+00> : vector<2x102xf32>
    %162 = tpu.matmul %161, %59, %cst_81 {dimension_numbers = #tpu.dot_dimension_numbers<[1], [0], [0], [1], [0, 0, 1, 1], [], []>} : vector<2x34xbf16>, vector<34x102xbf16>, vector<2x102xf32> -> vector<2x102xf32>
    %163 = vector.extract_strided_slice %160 {offsets = [0, 0], sizes = [2, 68], strides = [1, 1]} : vector<2x102xf32> to vector<2x68xf32>
    %164 = vector.extract_strided_slice %162 {offsets = [0, 0], sizes = [2, 68], strides = [1, 1]} : vector<2x102xf32> to vector<2x68xf32>
    %165 = arith.addf %163, %164 : vector<2x68xf32>
    %166 = arith.negf %165 : vector<2x68xf32>
    %167 = math.exp %166 : vector<2x68xf32>
    %cst_82 = arith.constant 1.000000e+00 : f32
    %168 = vector.broadcast %cst_82 : f32 to vector<2x68xf32>
    %169 = arith.addf %168, %167 : vector<2x68xf32>
    %170 = arith.divf %168, %169 : vector<2x68xf32>
    %171 = vector.extract_strided_slice %170 {offsets = [0, 0], sizes = [2, 34], strides = [1, 1]} : vector<2x68xf32> to vector<2x34xf32>
    %172 = vector.extract_strided_slice %170 {offsets = [0, 34], sizes = [2, 34], strides = [1, 1]} : vector<2x68xf32> to vector<2x34xf32>
    %173 = vector.extract_strided_slice %160 {offsets = [0, 68], sizes = [2, 34], strides = [1, 1]} : vector<2x102xf32> to vector<2x34xf32>
    %174 = vector.extract_strided_slice %162 {offsets = [0, 68], sizes = [2, 34], strides = [1, 1]} : vector<2x102xf32> to vector<2x34xf32>
    %175 = arith.addf %174, %62 : vector<2x34xf32>
    %176 = arith.mulf %171, %175 : vector<2x34xf32>
    %177 = arith.addf %173, %176 : vector<2x34xf32>
    %178 = math.tanh %177 : vector<2x34xf32>
    %cst_83 = arith.constant 1.000000e+00 : f32
    %179 = vector.broadcast %cst_83 : f32 to vector<2x34xf32>
    %180 = arith.subf %179, %172 : vector<2x34xf32>
    %181 = arith.mulf %180, %178 : vector<2x34xf32>
    %182 = arith.mulf %172, %159 : vector<2x34xf32>
    %183 = arith.addf %181, %182 : vector<2x34xf32>
    %c5 = arith.constant 5 : index
    %c0_84 = arith.constant 0 : index
    %184 = tpu.strided_load %arg9[%c5, %c0_84] {strides = array<i32: 16, 1>} : memref<32x102xf32, #tpu.memory_space<vmem>>, vector<2x102xf32>
    %185 = arith.truncf %183 : vector<2x34xf32> to vector<2x34xbf16>
    %cst_85 = arith.constant dense<0.000000e+00> : vector<2x102xf32>
    %186 = tpu.matmul %185, %59, %cst_85 {dimension_numbers = #tpu.dot_dimension_numbers<[1], [0], [0], [1], [0, 0, 1, 1], [], []>} : vector<2x34xbf16>, vector<34x102xbf16>, vector<2x102xf32> -> vector<2x102xf32>
    %187 = vector.extract_strided_slice %184 {offsets = [0, 0], sizes = [2, 68], strides = [1, 1]} : vector<2x102xf32> to vector<2x68xf32>
    %188 = vector.extract_strided_slice %186 {offsets = [0, 0], sizes = [2, 68], strides = [1, 1]} : vector<2x102xf32> to vector<2x68xf32>
    %189 = arith.addf %187, %188 : vector<2x68xf32>
    %190 = arith.negf %189 : vector<2x68xf32>
    %191 = math.exp %190 : vector<2x68xf32>
    %cst_86 = arith.constant 1.000000e+00 : f32
    %192 = vector.broadcast %cst_86 : f32 to vector<2x68xf32>
    %193 = arith.addf %192, %191 : vector<2x68xf32>
    %194 = arith.divf %192, %193 : vector<2x68xf32>
    %195 = vector.extract_strided_slice %194 {offsets = [0, 0], sizes = [2, 34], strides = [1, 1]} : vector<2x68xf32> to vector<2x34xf32>
    %196 = vector.extract_strided_slice %194 {offsets = [0, 34], sizes = [2, 34], strides = [1, 1]} : vector<2x68xf32> to vector<2x34xf32>
    %197 = vector.extract_strided_slice %184 {offsets = [0, 68], sizes = [2, 34], strides = [1, 1]} : vector<2x102xf32> to vector<2x34xf32>
    %198 = vector.extract_strided_slice %186 {offsets = [0, 68], sizes = [2, 34], strides = [1, 1]} : vector<2x102xf32> to vector<2x34xf32>
    %199 = arith.addf %198, %62 : vector<2x34xf32>
    %200 = arith.mulf %195, %199 : vector<2x34xf32>
    %201 = arith.addf %197, %200 : vector<2x34xf32>
    %202 = math.tanh %201 : vector<2x34xf32>
    %cst_87 = arith.constant 1.000000e+00 : f32
    %203 = vector.broadcast %cst_87 : f32 to vector<2x34xf32>
    %204 = arith.subf %203, %196 : vector<2x34xf32>
    %205 = arith.mulf %204, %202 : vector<2x34xf32>
    %206 = arith.mulf %196, %183 : vector<2x34xf32>
    %207 = arith.addf %205, %206 : vector<2x34xf32>
    %c6 = arith.constant 6 : index
    %c0_88 = arith.constant 0 : index
    %208 = tpu.strided_load %arg9[%c6, %c0_88] {strides = array<i32: 16, 1>} : memref<32x102xf32, #tpu.memory_space<vmem>>, vector<2x102xf32>
    %209 = arith.truncf %207 : vector<2x34xf32> to vector<2x34xbf16>
    %cst_89 = arith.constant dense<0.000000e+00> : vector<2x102xf32>
    %210 = tpu.matmul %209, %59, %cst_89 {dimension_numbers = #tpu.dot_dimension_numbers<[1], [0], [0], [1], [0, 0, 1, 1], [], []>} : vector<2x34xbf16>, vector<34x102xbf16>, vector<2x102xf32> -> vector<2x102xf32>
    %211 = vector.extract_strided_slice %208 {offsets = [0, 0], sizes = [2, 68], strides = [1, 1]} : vector<2x102xf32> to vector<2x68xf32>
    %212 = vector.extract_strided_slice %210 {offsets = [0, 0], sizes = [2, 68], strides = [1, 1]} : vector<2x102xf32> to vector<2x68xf32>
    %213 = arith.addf %211, %212 : vector<2x68xf32>
    %214 = arith.negf %213 : vector<2x68xf32>
    %215 = math.exp %214 : vector<2x68xf32>
    %cst_90 = arith.constant 1.000000e+00 : f32
    %216 = vector.broadcast %cst_90 : f32 to vector<2x68xf32>
    %217 = arith.addf %216, %215 : vector<2x68xf32>
    %218 = arith.divf %216, %217 : vector<2x68xf32>
    %219 = vector.extract_strided_slice %218 {offsets = [0, 0], sizes = [2, 34], strides = [1, 1]} : vector<2x68xf32> to vector<2x34xf32>
    %220 = vector.extract_strided_slice %218 {offsets = [0, 34], sizes = [2, 34], strides = [1, 1]} : vector<2x68xf32> to vector<2x34xf32>
    %221 = vector.extract_strided_slice %208 {offsets = [0, 68], sizes = [2, 34], strides = [1, 1]} : vector<2x102xf32> to vector<2x34xf32>
    %222 = vector.extract_strided_slice %210 {offsets = [0, 68], sizes = [2, 34], strides = [1, 1]} : vector<2x102xf32> to vector<2x34xf32>
    %223 = arith.addf %222, %62 : vector<2x34xf32>
    %224 = arith.mulf %219, %223 : vector<2x34xf32>
    %225 = arith.addf %221, %224 : vector<2x34xf32>
    %226 = math.tanh %225 : vector<2x34xf32>
    %cst_91 = arith.constant 1.000000e+00 : f32
    %227 = vector.broadcast %cst_91 : f32 to vector<2x34xf32>
    %228 = arith.subf %227, %220 : vector<2x34xf32>
    %229 = arith.mulf %228, %226 : vector<2x34xf32>
    %230 = arith.mulf %220, %207 : vector<2x34xf32>
    %231 = arith.addf %229, %230 : vector<2x34xf32>
    %c7 = arith.constant 7 : index
    %c0_92 = arith.constant 0 : index
    %232 = tpu.strided_load %arg9[%c7, %c0_92] {strides = array<i32: 16, 1>} : memref<32x102xf32, #tpu.memory_space<vmem>>, vector<2x102xf32>
    %233 = arith.truncf %231 : vector<2x34xf32> to vector<2x34xbf16>
    %cst_93 = arith.constant dense<0.000000e+00> : vector<2x102xf32>
    %234 = tpu.matmul %233, %59, %cst_93 {dimension_numbers = #tpu.dot_dimension_numbers<[1], [0], [0], [1], [0, 0, 1, 1], [], []>} : vector<2x34xbf16>, vector<34x102xbf16>, vector<2x102xf32> -> vector<2x102xf32>
    %235 = vector.extract_strided_slice %232 {offsets = [0, 0], sizes = [2, 68], strides = [1, 1]} : vector<2x102xf32> to vector<2x68xf32>
    %236 = vector.extract_strided_slice %234 {offsets = [0, 0], sizes = [2, 68], strides = [1, 1]} : vector<2x102xf32> to vector<2x68xf32>
    %237 = arith.addf %235, %236 : vector<2x68xf32>
    %238 = arith.negf %237 : vector<2x68xf32>
    %239 = math.exp %238 : vector<2x68xf32>
    %cst_94 = arith.constant 1.000000e+00 : f32
    %240 = vector.broadcast %cst_94 : f32 to vector<2x68xf32>
    %241 = arith.addf %240, %239 : vector<2x68xf32>
    %242 = arith.divf %240, %241 : vector<2x68xf32>
    %243 = vector.extract_strided_slice %242 {offsets = [0, 0], sizes = [2, 34], strides = [1, 1]} : vector<2x68xf32> to vector<2x34xf32>
    %244 = vector.extract_strided_slice %242 {offsets = [0, 34], sizes = [2, 34], strides = [1, 1]} : vector<2x68xf32> to vector<2x34xf32>
    %245 = vector.extract_strided_slice %232 {offsets = [0, 68], sizes = [2, 34], strides = [1, 1]} : vector<2x102xf32> to vector<2x34xf32>
    %246 = vector.extract_strided_slice %234 {offsets = [0, 68], sizes = [2, 34], strides = [1, 1]} : vector<2x102xf32> to vector<2x34xf32>
    %247 = arith.addf %246, %62 : vector<2x34xf32>
    %248 = arith.mulf %243, %247 : vector<2x34xf32>
    %249 = arith.addf %245, %248 : vector<2x34xf32>
    %250 = math.tanh %249 : vector<2x34xf32>
    %cst_95 = arith.constant 1.000000e+00 : f32
    %251 = vector.broadcast %cst_95 : f32 to vector<2x34xf32>
    %252 = arith.subf %251, %244 : vector<2x34xf32>
    %253 = arith.mulf %252, %250 : vector<2x34xf32>
    %254 = arith.mulf %244, %231 : vector<2x34xf32>
    %255 = arith.addf %253, %254 : vector<2x34xf32>
    %c8 = arith.constant 8 : index
    %c0_96 = arith.constant 0 : index
    %256 = tpu.strided_load %arg9[%c8, %c0_96] {strides = array<i32: 16, 1>} : memref<32x102xf32, #tpu.memory_space<vmem>>, vector<2x102xf32>
    %257 = arith.truncf %255 : vector<2x34xf32> to vector<2x34xbf16>
    %cst_97 = arith.constant dense<0.000000e+00> : vector<2x102xf32>
    %258 = tpu.matmul %257, %59, %cst_97 {dimension_numbers = #tpu.dot_dimension_numbers<[1], [0], [0], [1], [0, 0, 1, 1], [], []>} : vector<2x34xbf16>, vector<34x102xbf16>, vector<2x102xf32> -> vector<2x102xf32>
    %259 = vector.extract_strided_slice %256 {offsets = [0, 0], sizes = [2, 68], strides = [1, 1]} : vector<2x102xf32> to vector<2x68xf32>
    %260 = vector.extract_strided_slice %258 {offsets = [0, 0], sizes = [2, 68], strides = [1, 1]} : vector<2x102xf32> to vector<2x68xf32>
    %261 = arith.addf %259, %260 : vector<2x68xf32>
    %262 = arith.negf %261 : vector<2x68xf32>
    %263 = math.exp %262 : vector<2x68xf32>
    %cst_98 = arith.constant 1.000000e+00 : f32
    %264 = vector.broadcast %cst_98 : f32 to vector<2x68xf32>
    %265 = arith.addf %264, %263 : vector<2x68xf32>
    %266 = arith.divf %264, %265 : vector<2x68xf32>
    %267 = vector.extract_strided_slice %266 {offsets = [0, 0], sizes = [2, 34], strides = [1, 1]} : vector<2x68xf32> to vector<2x34xf32>
    %268 = vector.extract_strided_slice %266 {offsets = [0, 34], sizes = [2, 34], strides = [1, 1]} : vector<2x68xf32> to vector<2x34xf32>
    %269 = vector.extract_strided_slice %256 {offsets = [0, 68], sizes = [2, 34], strides = [1, 1]} : vector<2x102xf32> to vector<2x34xf32>
    %270 = vector.extract_strided_slice %258 {offsets = [0, 68], sizes = [2, 34], strides = [1, 1]} : vector<2x102xf32> to vector<2x34xf32>
    %271 = arith.addf %270, %62 : vector<2x34xf32>
    %272 = arith.mulf %267, %271 : vector<2x34xf32>
    %273 = arith.addf %269, %272 : vector<2x34xf32>
    %274 = math.tanh %273 : vector<2x34xf32>
    %cst_99 = arith.constant 1.000000e+00 : f32
    %275 = vector.broadcast %cst_99 : f32 to vector<2x34xf32>
    %276 = arith.subf %275, %268 : vector<2x34xf32>
    %277 = arith.mulf %276, %274 : vector<2x34xf32>
    %278 = arith.mulf %268, %255 : vector<2x34xf32>
    %279 = arith.addf %277, %278 : vector<2x34xf32>
    %c9 = arith.constant 9 : index
    %c0_100 = arith.constant 0 : index
    %280 = tpu.strided_load %arg9[%c9, %c0_100] {strides = array<i32: 16, 1>} : memref<32x102xf32, #tpu.memory_space<vmem>>, vector<2x102xf32>
    %281 = arith.truncf %279 : vector<2x34xf32> to vector<2x34xbf16>
    %cst_101 = arith.constant dense<0.000000e+00> : vector<2x102xf32>
    %282 = tpu.matmul %281, %59, %cst_101 {dimension_numbers = #tpu.dot_dimension_numbers<[1], [0], [0], [1], [0, 0, 1, 1], [], []>} : vector<2x34xbf16>, vector<34x102xbf16>, vector<2x102xf32> -> vector<2x102xf32>
    %283 = vector.extract_strided_slice %280 {offsets = [0, 0], sizes = [2, 68], strides = [1, 1]} : vector<2x102xf32> to vector<2x68xf32>
    %284 = vector.extract_strided_slice %282 {offsets = [0, 0], sizes = [2, 68], strides = [1, 1]} : vector<2x102xf32> to vector<2x68xf32>
    %285 = arith.addf %283, %284 : vector<2x68xf32>
    %286 = arith.negf %285 : vector<2x68xf32>
    %287 = math.exp %286 : vector<2x68xf32>
    %cst_102 = arith.constant 1.000000e+00 : f32
    %288 = vector.broadcast %cst_102 : f32 to vector<2x68xf32>
    %289 = arith.addf %288, %287 : vector<2x68xf32>
    %290 = arith.divf %288, %289 : vector<2x68xf32>
    %291 = vector.extract_strided_slice %290 {offsets = [0, 0], sizes = [2, 34], strides = [1, 1]} : vector<2x68xf32> to vector<2x34xf32>
    %292 = vector.extract_strided_slice %290 {offsets = [0, 34], sizes = [2, 34], strides = [1, 1]} : vector<2x68xf32> to vector<2x34xf32>
    %293 = vector.extract_strided_slice %280 {offsets = [0, 68], sizes = [2, 34], strides = [1, 1]} : vector<2x102xf32> to vector<2x34xf32>
    %294 = vector.extract_strided_slice %282 {offsets = [0, 68], sizes = [2, 34], strides = [1, 1]} : vector<2x102xf32> to vector<2x34xf32>
    %295 = arith.addf %294, %62 : vector<2x34xf32>
    %296 = arith.mulf %291, %295 : vector<2x34xf32>
    %297 = arith.addf %293, %296 : vector<2x34xf32>
    %298 = math.tanh %297 : vector<2x34xf32>
    %cst_103 = arith.constant 1.000000e+00 : f32
    %299 = vector.broadcast %cst_103 : f32 to vector<2x34xf32>
    %300 = arith.subf %299, %292 : vector<2x34xf32>
    %301 = arith.mulf %300, %298 : vector<2x34xf32>
    %302 = arith.mulf %292, %279 : vector<2x34xf32>
    %303 = arith.addf %301, %302 : vector<2x34xf32>
    %c10 = arith.constant 10 : index
    %c0_104 = arith.constant 0 : index
    %304 = tpu.strided_load %arg9[%c10, %c0_104] {strides = array<i32: 16, 1>} : memref<32x102xf32, #tpu.memory_space<vmem>>, vector<2x102xf32>
    %305 = arith.truncf %303 : vector<2x34xf32> to vector<2x34xbf16>
    %cst_105 = arith.constant dense<0.000000e+00> : vector<2x102xf32>
    %306 = tpu.matmul %305, %59, %cst_105 {dimension_numbers = #tpu.dot_dimension_numbers<[1], [0], [0], [1], [0, 0, 1, 1], [], []>} : vector<2x34xbf16>, vector<34x102xbf16>, vector<2x102xf32> -> vector<2x102xf32>
    %307 = vector.extract_strided_slice %304 {offsets = [0, 0], sizes = [2, 68], strides = [1, 1]} : vector<2x102xf32> to vector<2x68xf32>
    %308 = vector.extract_strided_slice %306 {offsets = [0, 0], sizes = [2, 68], strides = [1, 1]} : vector<2x102xf32> to vector<2x68xf32>
    %309 = arith.addf %307, %308 : vector<2x68xf32>
    %310 = arith.negf %309 : vector<2x68xf32>
    %311 = math.exp %310 : vector<2x68xf32>
    %cst_106 = arith.constant 1.000000e+00 : f32
    %312 = vector.broadcast %cst_106 : f32 to vector<2x68xf32>
    %313 = arith.addf %312, %311 : vector<2x68xf32>
    %314 = arith.divf %312, %313 : vector<2x68xf32>
    %315 = vector.extract_strided_slice %314 {offsets = [0, 0], sizes = [2, 34], strides = [1, 1]} : vector<2x68xf32> to vector<2x34xf32>
    %316 = vector.extract_strided_slice %314 {offsets = [0, 34], sizes = [2, 34], strides = [1, 1]} : vector<2x68xf32> to vector<2x34xf32>
    %317 = vector.extract_strided_slice %304 {offsets = [0, 68], sizes = [2, 34], strides = [1, 1]} : vector<2x102xf32> to vector<2x34xf32>
    %318 = vector.extract_strided_slice %306 {offsets = [0, 68], sizes = [2, 34], strides = [1, 1]} : vector<2x102xf32> to vector<2x34xf32>
    %319 = arith.addf %318, %62 : vector<2x34xf32>
    %320 = arith.mulf %315, %319 : vector<2x34xf32>
    %321 = arith.addf %317, %320 : vector<2x34xf32>
    %322 = math.tanh %321 : vector<2x34xf32>
    %cst_107 = arith.constant 1.000000e+00 : f32
    %323 = vector.broadcast %cst_107 : f32 to vector<2x34xf32>
    %324 = arith.subf %323, %316 : vector<2x34xf32>
    %325 = arith.mulf %324, %322 : vector<2x34xf32>
    %326 = arith.mulf %316, %303 : vector<2x34xf32>
    %327 = arith.addf %325, %326 : vector<2x34xf32>
    %c11 = arith.constant 11 : index
    %c0_108 = arith.constant 0 : index
    %328 = tpu.strided_load %arg9[%c11, %c0_108] {strides = array<i32: 16, 1>} : memref<32x102xf32, #tpu.memory_space<vmem>>, vector<2x102xf32>
    %329 = arith.truncf %327 : vector<2x34xf32> to vector<2x34xbf16>
    %cst_109 = arith.constant dense<0.000000e+00> : vector<2x102xf32>
    %330 = tpu.matmul %329, %59, %cst_109 {dimension_numbers = #tpu.dot_dimension_numbers<[1], [0], [0], [1], [0, 0, 1, 1], [], []>} : vector<2x34xbf16>, vector<34x102xbf16>, vector<2x102xf32> -> vector<2x102xf32>
    %331 = vector.extract_strided_slice %328 {offsets = [0, 0], sizes = [2, 68], strides = [1, 1]} : vector<2x102xf32> to vector<2x68xf32>
    %332 = vector.extract_strided_slice %330 {offsets = [0, 0], sizes = [2, 68], strides = [1, 1]} : vector<2x102xf32> to vector<2x68xf32>
    %333 = arith.addf %331, %332 : vector<2x68xf32>
    %334 = arith.negf %333 : vector<2x68xf32>
    %335 = math.exp %334 : vector<2x68xf32>
    %cst_110 = arith.constant 1.000000e+00 : f32
    %336 = vector.broadcast %cst_110 : f32 to vector<2x68xf32>
    %337 = arith.addf %336, %335 : vector<2x68xf32>
    %338 = arith.divf %336, %337 : vector<2x68xf32>
    %339 = vector.extract_strided_slice %338 {offsets = [0, 0], sizes = [2, 34], strides = [1, 1]} : vector<2x68xf32> to vector<2x34xf32>
    %340 = vector.extract_strided_slice %338 {offsets = [0, 34], sizes = [2, 34], strides = [1, 1]} : vector<2x68xf32> to vector<2x34xf32>
    %341 = vector.extract_strided_slice %328 {offsets = [0, 68], sizes = [2, 34], strides = [1, 1]} : vector<2x102xf32> to vector<2x34xf32>
    %342 = vector.extract_strided_slice %330 {offsets = [0, 68], sizes = [2, 34], strides = [1, 1]} : vector<2x102xf32> to vector<2x34xf32>
    %343 = arith.addf %342, %62 : vector<2x34xf32>
    %344 = arith.mulf %339, %343 : vector<2x34xf32>
    %345 = arith.addf %341, %344 : vector<2x34xf32>
    %346 = math.tanh %345 : vector<2x34xf32>
    %cst_111 = arith.constant 1.000000e+00 : f32
    %347 = vector.broadcast %cst_111 : f32 to vector<2x34xf32>
    %348 = arith.subf %347, %340 : vector<2x34xf32>
    %349 = arith.mulf %348, %346 : vector<2x34xf32>
    %350 = arith.mulf %340, %327 : vector<2x34xf32>
    %351 = arith.addf %349, %350 : vector<2x34xf32>
    %cst_112 = arith.constant 0.000000e+00 : f32
    %352 = vector.broadcast %cst_112 : f32 to vector<2x34xf32>
    %353 = arith.cmpf ogt, %351, %352 : vector<2x34xf32>
    %cst_113 = arith.constant 0.00999999977 : f32
    %354 = vector.broadcast %cst_113 : f32 to vector<2x34xf32>
    %355 = arith.mulf %354, %351 : vector<2x34xf32>
    %356 = arith.select %353, %351, %355 : vector<2x34xi1>, vector<2x34xf32>
    %c0_114 = arith.constant 0 : index
    %c0_115 = arith.constant 0 : index
    %357 = vector.load %arg1[%c0_114, %c0_115] : memref<2x34xf32, #tpu.memory_space<vmem>>, vector<2x17xf32>
    %358 = arith.truncf %357 : vector<2x17xf32> to vector<2x17xbf16>
    %c0_116 = arith.constant 0 : index
    %c17_117 = arith.constant 17 : index
    %359 = vector.load %arg1[%c0_116, %c17_117] : memref<2x34xf32, #tpu.memory_space<vmem>>, vector<2x17xf32>
    %360 = arith.truncf %359 : vector<2x17xf32> to vector<2x17xbf16>
    %c80 = arith.constant 80 : index
    %c0_118 = arith.constant 0 : index
    %361 = vector.load %arg4[%c80, %c0_118] : memref<160x102xbf16, #tpu.memory_space<vmem>>, vector<34x36xbf16>
    %c128_119 = arith.constant 128 : index
    %c0_120 = arith.constant 0 : index
    %362 = vector.load %arg4[%c128_119, %c0_120] : memref<160x102xbf16, #tpu.memory_space<vmem>>, vector<17x36xbf16>
    %363 = arith.truncf %356 : vector<2x34xf32> to vector<2x34xbf16>
    %364 = vector.extract_strided_slice %361 {offsets = [0, 0], sizes = [34, 34], strides = [1, 1]} : vector<34x36xbf16> to vector<34x34xbf16>
    %cst_121 = arith.constant dense<0.000000e+00> : vector<2x34xf32>
    %365 = tpu.matmul %363, %364, %cst_121 {dimension_numbers = #tpu.dot_dimension_numbers<[1], [0], [0], [1], [0, 0, 1, 1], [], []>} : vector<2x34xbf16>, vector<34x34xbf16>, vector<2x34xf32> -> vector<2x34xf32>
    %366 = vector.extract_strided_slice %362 {offsets = [0, 0], sizes = [17, 34], strides = [1, 1]} : vector<17x36xbf16> to vector<17x34xbf16>
    %cst_122 = arith.constant dense<0.000000e+00> : vector<2x34xf32>
    %367 = tpu.matmul %358, %366, %cst_122 {dimension_numbers = #tpu.dot_dimension_numbers<[1], [0], [0], [1], [0, 0, 1, 1], [], []>} : vector<2x17xbf16>, vector<17x34xbf16>, vector<2x34xf32> -> vector<2x34xf32>
    %368 = arith.addf %365, %367 : vector<2x34xf32>
    %c4_123 = arith.constant 4 : index
    %c0_124 = arith.constant 0 : index
    %369 = vector.load %arg5[%c4_123, %c0_124] : memref<6x224xf32, #tpu.memory_space<vmem>>, vector<1x34xf32>
    %370 = vector.broadcast %369 : vector<1x34xf32> to vector<2x34xf32>
    %371 = arith.addf %368, %370 : vector<2x34xf32>
    %cst_125 = arith.constant 0.000000e+00 : f32
    %372 = vector.broadcast %cst_125 : f32 to vector<2x34xf32>
    %373 = arith.cmpf ogt, %371, %372 : vector<2x34xf32>
    %cst_126 = arith.constant 0.00999999977 : f32
    %374 = vector.broadcast %cst_126 : f32 to vector<2x34xf32>
    %375 = arith.mulf %374, %371 : vector<2x34xf32>
    %376 = arith.select %373, %371, %375 : vector<2x34xi1>, vector<2x34xf32>
    %377 = arith.truncf %376 : vector<2x34xf32> to vector<2x34xbf16>
    %378 = vector.extract_strided_slice %361 {offsets = [0, 34], sizes = [34, 2], strides = [1, 1]} : vector<34x36xbf16> to vector<34x2xbf16>
    %cst_127 = arith.constant dense<0.000000e+00> : vector<2x2xf32>
    %379 = tpu.matmul %377, %378, %cst_127 {dimension_numbers = #tpu.dot_dimension_numbers<[1], [0], [0], [1], [0, 0, 1, 1], [], []>} : vector<2x34xbf16>, vector<34x2xbf16>, vector<2x2xf32> -> vector<2x2xf32>
    %380 = vector.extract_strided_slice %362 {offsets = [0, 34], sizes = [17, 2], strides = [1, 1]} : vector<17x36xbf16> to vector<17x2xbf16>
    %cst_128 = arith.constant dense<0.000000e+00> : vector<2x2xf32>
    %381 = tpu.matmul %360, %380, %cst_128 {dimension_numbers = #tpu.dot_dimension_numbers<[1], [0], [0], [1], [0, 0, 1, 1], [], []>} : vector<2x17xbf16>, vector<17x2xbf16>, vector<2x2xf32> -> vector<2x2xf32>
    %382 = arith.addf %379, %381 : vector<2x2xf32>
    %c5_129 = arith.constant 5 : index
    %c0_130 = arith.constant 0 : index
    %383 = vector.load %arg5[%c5_129, %c0_130] : memref<6x224xf32, #tpu.memory_space<vmem>>, vector<1x2xf32>
    %384 = vector.broadcast %383 : vector<1x2xf32> to vector<2x2xf32>
    %385 = arith.addf %382, %384 : vector<2x2xf32>
    %cst_131 = arith.constant 0.000000e+00 : f32
    %386 = vector.broadcast %cst_131 : f32 to vector<2x2xf32>
    %387 = arith.cmpf ogt, %385, %386 : vector<2x2xf32>
    %cst_132 = arith.constant 0.00999999977 : f32
    %388 = vector.broadcast %cst_132 : f32 to vector<2x2xf32>
    %389 = arith.mulf %388, %385 : vector<2x2xf32>
    %390 = arith.select %387, %385, %389 : vector<2x2xi1>, vector<2x2xf32>
    %c0_133 = arith.constant 0 : index
    %c0_134 = arith.constant 0 : index
    %391 = vector.load %arg6[%c0_133, %c0_134] : memref<2x2xf32, #tpu.memory_space<vmem>>, vector<2x2xf32>
    tpu.vector_store %arg6[%c0_133, %c0_134], %390 {strides = array<i32>} : memref<2x2xf32, #tpu.memory_space<vmem>>, vector<2x2xf32>,
    return
  }
}

</mosaic_0001>

<bundles_post_ra>
// kernel: double_cnn_gru_critic.1
= control target key start
LH: loop header
LB: loop body
LE: loop exit
PB: predicated region body
PF: predicated region fallthrough
CT: control target
= control target key end

     0   :  { %vm62_vm0 = vcmask 523264   ;;  %vm64_vm1 = vcmask 521216   ;;  %v2748_v63 = vmov 0.0   ;;  %vm546_vm4 = vcmask 1046528   ;;  %s2751_s27 = smov 60   ;;  %s2752_s30 = smov 94   ;;  %s3550_s2 = inlined_call_operand.vmem [shape: bf16[384,224], index: 2, kind: input, shape index: {}]   ;;  %s3551_s0 = inlined_call_operand.vmem [shape: f32[32,64], index: 0, kind: input, shape index: {}]   ;;  %s3552_s3 = inlined_call_operand.vmem [shape: bf16[768,24], index: 3, kind: input, shape index: {}]   ;;  %s3553_s5 = inlined_call_operand.vmem [shape: f32[6,224], index: 5, kind: input, shape index: {}]   ;;  %s3554_s4 = inlined_call_operand.vmem [shape: bf16[160,102], index: 4, kind: input, shape index: {}]   ;;  %s3555_s1 = inlined_call_operand.vmem [shape: f32[2,34], index: 1, kind: input, shape index: {}]   ;;  %s3556_s6 = inlined_call_operand.vmem [shape: f32[2,2], index: 6, kind: output, shape index: {}]  }
   0x1   :  { %v2189_v0 = vld [vmem:[%s3550_s2 + $0x70] sm:$0xf]  ;;  %v2583_v1 = vld [vmem:[%s3550_s2 + $0x74] sm:$0xf0]  ;;  %v2181_v9 = vld [vmem:[%s3550_s2 + $0x60] sm:$0xf] }
   0x2   :  { %v2253_v2 = vld [vmem:[%s3550_s2 + $0xf0] sm:$0xf]  ;;  %v2190_v3 = vor.u32 %v2583_v1, %v2189_v0  ;;  %v2599_v4 = vld [vmem:[%s3550_s2 + $0xf4] sm:$0xf0]  ;;  %v2581_v10 = vld [vmem:[%s3550_s2 + $0x64] sm:$0xf0] }
   0x3   :  { %v2317_v5 = vld [vmem:[%s3550_s2 + $0x170] sm:$0xf]  ;;  %v2615_v6 = vld [vmem:[%s3550_s2 + $0x174] sm:$0xf0]  ;;  %v2254_v7 = vor.u32 %v2599_v4, %v2253_v2  ;;  %v2245_v11 = vld [vmem:[%s3550_s2 + $0xe0] sm:$0xf]  ;;  %v2182_v12 = vor.u32 %v2581_v10, %v2181_v9 }
   0x4   :  { %v2318_v8 = vor.u32 %v2615_v6, %v2317_v5  ;;  %398 = vmatpush.bf16.msra.mxu0 %v2190_v3  ;;  %v2597_v13 = vld [vmem:[%s3550_s2 + $0xe4] sm:$0xf0]  ;;  %v2309_v14 = vld [vmem:[%s3550_s2 + $0x160] sm:$0xf]  ;;  %v2173_v18 = vld [vmem:[%s3550_s2 + $0x50] sm:$0xf] }
   0x5   :  { %v2613_v15 = vld [vmem:[%s3550_s2 + $0x164] sm:$0xf0]  ;;  %417 = vmatpush.bf16.msra.mxu1 %v2254_v7  ;;  %v2246_v16 = vor.u32 %v2597_v13, %v2245_v11  ;;  %v2579_v19 = vld [vmem:[%s3550_s2 + $0x54] sm:$0xf0]  ;;  %v2237_v20 = vld [vmem:[%s3550_s2 + $0xd0] sm:$0xf] }
   0x6   :  { %436 = vmatpush.bf16.msra.mxu2 %v2318_v8  ;;  %v2310_v17 = vor.u32 %v2613_v15, %v2309_v14  ;;  %v2595_v21 = vld [vmem:[%s3550_s2 + $0xd4] sm:$0xf0]  ;;  %v2301_v22 = vld [vmem:[%s3550_s2 + $0x150] sm:$0xf]  ;;  %v2174_v24 = vor.u32 %v2579_v19, %v2173_v18  ;;  %v2165_v27 = vld [vmem:[%s3550_s2 + $0x40] sm:$0xf] }
   0x7   :  { %v2611_v23 = vld [vmem:[%s3550_s2 + $0x154] sm:$0xf0]  ;;  %v2238_v25 = vor.u32 %v2595_v21, %v2237_v20  ;;  %v2577_v28 = vld [vmem:[%s3550_s2 + $0x44] sm:$0xf0]  ;;  %v2229_v29 = vld [vmem:[%s3550_s2 + $0xc0] sm:$0xf] }
   0x8   :  { %399 = vmatpush.bf16.msra.mxu0 %v2182_v12  ;;  %v2302_v26 = vor.u32 %v2611_v23, %v2301_v22  ;;  %v2593_v30 = vld [vmem:[%s3550_s2 + $0xc4] sm:$0xf0]  ;;  %v2293_v31 = vld [vmem:[%s3550_s2 + $0x140] sm:$0xf]  ;;  %v2582_v33 = vld [vmem:[%s3550_s2 + $0x74] sm:$0xf]  ;;  %v2166_v35 = vor.u32 %v2577_v28, %v2165_v27 }
   0x9   :  { %418 = vmatpush.bf16.msra.mxu1 %v2246_v16  ;;  %v2609_v32 = vld [vmem:[%s3550_s2 + $0x144] sm:$0xf0]  ;;  %v2191_v34 = vld [vmem:[%s3550_s2 + $0x78] sm:$0xf0]  ;;  %v2157_v36 = vld [vmem:[%s3550_s2 + $0x30] sm:$0xf]  ;;  %v2230_v39 = vor.u32 %v2593_v30, %v2229_v29 }
   0xa   :  { %437 = vmatpush.bf16.msra.mxu2 %v2310_v17  ;;  %v2575_v37 = vld [vmem:[%s3550_s2 + $0x34] sm:$0xf0]  ;;  %v2194_v38 = vor.u32 %v2582_v33, %v2191_v34  ;;  %v2294_v40 = vor.u32 %v2609_v32, %v2293_v31  ;;  %v2221_v41 = vld [vmem:[%s3550_s2 + $0xb0] sm:$0xf]  ;;  %v2580_v43 = vld [vmem:[%s3550_s2 + $0x64] sm:$0xf] }
   0xb   :  { %v2591_v42 = vld [vmem:[%s3550_s2 + $0xb4] sm:$0xf0]  ;;  %v2285_v44 = vld [vmem:[%s3550_s2 + $0x130] sm:$0xf]  ;;  %v2183_v46 = vld [vmem:[%s3550_s2 + $0x68] sm:$0xf0]  ;;  %v2158_v48 = vor.u32 %v2575_v37, %v2157_v36 }
   0xc   :  { %400 = vmatpush.bf16.msra.mxu0 %v2174_v24  ;;  %v2607_v45 = vld [vmem:[%s3550_s2 + $0x134] sm:$0xf0]  ;;  %455 = vmatpush.bf16.msra.mxu3 %v2194_v38  ;;  %v2186_v47 = vor.u32 %v2580_v43, %v2183_v46  ;;  %v2578_v49 = vld [vmem:[%s3550_s2 + $0x54] sm:$0xf]  ;;  %v2175_v50 = vld [vmem:[%s3550_s2 + $0x58] sm:$0xf0]  ;;  %v2222_v51 = vor.u32 %v2591_v42, %v2221_v41 }
   0xd   :  { %419 = vmatpush.bf16.msra.mxu1 %v2238_v25  ;;  %v2286_v52 = vor.u32 %v2607_v45, %v2285_v44  ;;  %v2149_v53 = vld [vmem:[%s3550_s2 + $0x20] sm:$0xf]  ;;  %v2573_v54 = vld [vmem:[%s3550_s2 + $0x24] sm:$0xf0]  ;;  %v2178_v59 = vor.u32 %v2578_v49, %v2175_v50  ;;  %v2141_v60 = vld [vmem:[%s3550_s2 + $0x10] sm:$0xf] }
   0xe   :  { %438 = vmatpush.bf16.msra.mxu2 %v2302_v26  ;;  %v2213_v55 = vld [vmem:[%s3550_s2 + $0xa0] sm:$0xf]  ;;  %v2589_v56 = vld [vmem:[%s3550_s2 + $0xa4] sm:$0xf0]  ;;  %v2576_v61 = vld [vmem:[%s3550_s2 + $0x44] sm:$0xf]  ;;  %v2150_v1 = vor.u32 %v2573_v54, %v2149_v53 }
   0xf   :  { %v2277_v57 = vld [vmem:[%s3550_s2 + $0x120] sm:$0xf]  ;;  %v2605_v58 = vld [vmem:[%s3550_s2 + $0x124] sm:$0xf0]  ;;  %v2167_v62 = vld [vmem:[%s3550_s2 + $0x48] sm:$0xf0]  ;;  %v2214_v4 = vor.u32 %v2589_v56, %v2213_v55 }
  0x10   :  { %401 = vmatpush.bf16.msra.mxu0 %v2166_v35  ;;  %456 = vmatpush.bf16.msra.mxu3 %v2186_v47  ;;  %24 = vst [vmem:[#allocation2] sm:$0xff] %v2748_v63  ;;  %v60_v0 = vld [vmem:[%s3551_s0] sm:$0xff]  ;;  %v2571_v2 = vld [vmem:[%s3550_s2 + $0x14] sm:$0xf0]  ;;  %v61_v3 = vld [vmem:[%s3551_s0 + $0x8] sm:$0x3f]  ;;  %v2278_v5 = vor.u32 %v2605_v58, %v2277_v57  ;;  %v2170_v10 = vor.u32 %v2576_v61, %v2167_v62 }
  0x11   :  { %420 = vmatpush.bf16.msra.mxu1 %v2230_v39  ;;  %27 = vst [vmem:[#allocation2 + $0x18] sm:$0xff] %v2748_v63  ;;  %v2205_v6 = vld [vmem:[%s3550_s2 + $0x90] sm:$0xf]  ;;  %v2587_v7 = vld [vmem:[%s3550_s2 + $0x94] sm:$0xf0]  ;;  %v2142_v11 = vor.u32 %v2571_v2, %v2141_v60  ;;  %vm561_vm5 = vcmask 1045504  }
  0x12   :  { %439 = vmatpush.bf16.msra.mxu2 %v2294_v40  ;;  %63 = vst.msk [vmem:[#allocation2] sm:$0xff] %vm62_vm0, %v60_v0  ;;  %v2269_v8 = vld [vmem:[%s3550_s2 + $0x110] sm:$0xf]  ;;  %v2603_v9 = vld [vmem:[%s3550_s2 + $0x114] sm:$0xf0]  ;;  %v2206_v14 = vor.u32 %v2587_v7, %v2205_v6  ;;  %vm537_vm9 = vcmask 785408  }
  0x13   :  { %65 = vst.msk [vmem:[#allocation2 + $0x18] sm:$0x3f] %vm64_vm1, %v61_v3  ;;  %v2133_v12 = vld [vmem:[%s3550_s2] sm:$0xf]  ;;  %v2569_v13 = vld [vmem:[%s3550_s2 + $0x4] sm:$0xf0]  ;;  %v2270_v15 = vor.u32 %v2603_v9, %v2269_v8 }
  0x14   :  { %402 = vmatpush.bf16.msra.mxu0 %v2158_v48  ;;  %457 = vmatpush.bf16.msra.mxu3 %v2178_v59  ;;  %25 = vst [vmem:[#allocation2 + $0x8] sm:$0xff] %v2748_v63  ;;  %v2197_v16 = vld [vmem:[%s3550_s2 + $0x80] sm:$0xf]  ;;  %v2585_v17 = vld [vmem:[%s3550_s2 + $0x84] sm:$0xf0]  ;;  %v2134_v20 = vor.u32 %v2569_v13, %v2133_v12  ;;  %vm540_vm11 = vcmask 781312  }
  0x15   :  { %421 = vmatpush.bf16.msra.mxu1 %v2222_v51  ;;  %26 = vst [vmem:[#allocation2 + $0x10] sm:$0xff] %v2748_v63  ;;  %v2261_v18 = vld [vmem:[%s3550_s2 + $0x100] sm:$0xf]  ;;  %v2601_v19 = vld [vmem:[%s3550_s2 + $0x104] sm:$0xf0]  ;;  %v2198_v22 = vor.u32 %v2585_v17, %v2197_v16  ;;  %vm1235_vm14 = vcmask 1040384  }
  0x16   :  { %440 = vmatpush.bf16.msra.mxu2 %v2286_v52  ;;  %28 = vst [vmem:[#allocation2 + $0x20] sm:$0xff] %v2748_v63  ;;  %v2262_v23 = vor.u32 %v2601_v19, %v2261_v18  ;;  %v2598_v25 = vld [vmem:[%s3550_s2 + $0xf4] sm:$0xf]  ;;  %v2255_v26 = vld [vmem:[%s3550_s2 + $0xf8] sm:$0xf0]  ;;  %vm1181_vm15 = vcmask 1043456  }
  0x17   :  { %29 = vst [vmem:[#allocation2 + $0x28] sm:$0xff] %v2748_v63  ;;  %v2258_v28 = vor.u32 %v2598_v25, %v2255_v26  ;;  %v2574_v29 = vld [vmem:[%s3550_s2 + $0x34] sm:$0xf]  ;;  %v2159_v30 = vld [vmem:[%s3550_s2 + $0x38] sm:$0xf0] }
  0x18   :  { %403 = vmatpush.bf16.msra.mxu0 %v2150_v1  ;;  %458 = vmatpush.bf16.msra.mxu3 %v2170_v10  ;;  %30 = vst [vmem:[#allocation2 + $0x30] sm:$0xff] %v2748_v63  ;;  %v2162_v31 = vor.u32 %v2574_v29, %v2159_v30  ;;  %v2614_v32 = vld [vmem:[%s3550_s2 + $0x174] sm:$0xf]  ;;  %v2319_v33 = vld [vmem:[%s3550_s2 + $0x178] sm:$0xf0] }
  0x19   :  { %422 = vmatpush.bf16.msra.mxu1 %v2214_v4  ;;  %v86_v21 = vld [vmem:[#allocation2] sm:$0xff]  ;;  %31 = vst [vmem:[#allocation2 + $0x38] sm:$0xff] %v2748_v63  ;;  %v2322_v34 = vor.u32 %v2614_v32, %v2319_v33  ;;  %v2247_v36 = vld [vmem:[%s3550_s2 + $0xe8] sm:$0xf0]  ;;  %v2594_v44 = vld [vmem:[%s3550_s2 + $0xd4] sm:$0xf] }
  0x1a   :  { %441 = vmatpush.bf16.msra.mxu2 %v2278_v5  ;;  %v89_v24 = vld [vmem:[#allocation2 + $0x18] sm:$0xff]  ;;  %32 = vst [vmem:[#allocation2 + $0x40] sm:$0xff] %v2748_v63  ;;  %v2596_v35 = vld [vmem:[%s3550_s2 + $0xe4] sm:$0xf]  ;;  %v2151_v39 = vld [vmem:[%s3550_s2 + $0x28] sm:$0xf0] }
  0x1b   :  { %33 = vst [vmem:[#allocation2 + $0x48] sm:$0xff] %v2748_v63  ;;  %v2981_v27 = vpack.c.bf16 %v89_v24, %v86_v21  ;;  %v2250_v37 = vor.u32 %v2596_v35, %v2247_v36  ;;  %v2572_v38 = vld [vmem:[%s3550_s2 + $0x24] sm:$0xf]  ;;  %v2311_v42 = vld [vmem:[%s3550_s2 + $0x168] sm:$0xf0] }
  0x1c   :  { %404 = vmatpush.bf16.msra.mxu0 %v2142_v11  ;;  %34 = vst [vmem:[#allocation2 + $0x50] sm:$0xff] %v2748_v63  ;;  %459 = vmatpush.bf16.msra.mxu3 %v2162_v31  ;;  %v2154_v40 = vor.u32 %v2572_v38, %v2151_v39  ;;  %v2612_v41 = vld [vmem:[%s3550_s2 + $0x164] sm:$0xf]  ;;  %v2239_v45 = vld [vmem:[%s3550_s2 + $0xd8] sm:$0xf0] }
  0x1d   :  { %423 = vmatpush.bf16.msra.mxu1 %v2206_v14  ;;  %35 = vst [vmem:[#allocation2 + $0x58] sm:$0xff] %v2748_v63  ;;  %v2314_v43 = vor.u32 %v2612_v41, %v2311_v42  ;;  %v2570_v46 = vld [vmem:[%s3550_s2 + $0x14] sm:$0xf]  ;;  %v2143_v47 = vld [vmem:[%s3550_s2 + $0x18] sm:$0xf0]  ;;  %v2242_v48 = vor.u32 %v2594_v44, %v2239_v45  ;;  %v66_v5 = vld [vmem:[%s3551_s0 + $0x1] sm:$0xff] }
  0x1e   :  { %442 = vmatpush.bf16.msra.mxu2 %v2270_v15  ;;  %37 = vst [vmem:[#allocation3 + $0x8] sm:$0xff] %v2748_v63  ;;  %v2146_v49 = vor.u32 %v2570_v46, %v2143_v47  ;;  %v2610_v50 = vld [vmem:[%s3550_s2 + $0x154] sm:$0xf]  ;;  %v2303_v51 = vld [vmem:[%s3550_s2 + $0x158] sm:$0xf0]  ;;  %v70_v11 = vld [vmem:[%s3551_s0 + $0x2] sm:$0xff] }
  0x1f   :  { %39 = vst [vmem:[#allocation3 + $0x18] sm:$0xff] %v2748_v63  ;;  %v2306_v52 = vor.u32 %v2610_v50, %v2303_v51  ;;  %v2592_v53 = vld [vmem:[%s3550_s2 + $0xc4] sm:$0xf]  ;;  %v2231_v54 = vld [vmem:[%s3550_s2 + $0xc8] sm:$0xf0]  ;;  %v74_v14 = vld [vmem:[%s3551_s0 + $0x10] sm:$0xff] }
  0x20   :  { %405 = vmatpush.bf16.msra.mxu0 %v2134_v20  ;;  %41 = vst [vmem:[#allocation3 + $0x28] sm:$0xff] %v2748_v63  ;;  %460 = vmatpush.bf16.msra.mxu3 %v2154_v40  ;;  %v2568_v55 = vld [vmem:[%s3550_s2 + $0x4] sm:$0xf]  ;;  %v2135_v56 = vld [vmem:[%s3550_s2 + $0x8] sm:$0xf0]  ;;  %v2234_v59 = vor.u32 %v2592_v53, %v2231_v54  ;;  %v78_v20 = vld [vmem:[%s3551_s0 + $0x11] sm:$0xff] }
  0x21   :  { %424 = vmatpush.bf16.msra.mxu1 %v2198_v22  ;;  %42 = vst [vmem:[#allocation3 + $0x30] sm:$0xff] %v2748_v63  ;;  %v2608_v57 = vld [vmem:[%s3550_s2 + $0x144] sm:$0xf]  ;;  %v2295_v58 = vld [vmem:[%s3550_s2 + $0x148] sm:$0xf0]  ;;  %v2138_v60 = vor.u32 %v2568_v55, %v2135_v56  ;;  %v2623_v47 = vld [vmem:[%s3552_s3 + $0x38] sm:$0xff] }
  0x22   :  { %443 = vmatpush.bf16.msra.mxu2 %v2262_v23  ;;  %43 = vst [vmem:[#allocation3 + $0x38] sm:$0xff] %v2748_v63  ;;  %v2298_v61 = vor.u32 %v2608_v57, %v2295_v58  ;;  %v2590_v62 = vld [vmem:[%s3550_s2 + $0xb4] sm:$0xf]  ;;  %v2223_v0 = vld [vmem:[%s3550_s2 + $0xb8] sm:$0xf0]  ;;  %v2621_v51 = vld [vmem:[%s3552_s3 + $0x28] sm:$0xff] }
  0x23   :  { %406 = vmatmul.bf16.vlgmr.msra.gmra.mxu0 %v2981_v27  ;;  %44 = vst [vmem:[#allocation3 + $0x40] sm:$0xff] %v2748_v63  ;;  %v67_v1 = vld [vmem:[%s3551_s0 + $0x9] sm:$0x3f]  ;;  %v2226_v2 = vor.u32 %v2590_v62, %v2223_v0  ;;  %v2606_v3 = vld [vmem:[%s3550_s2 + $0x134] sm:$0xf]  ;;  %v2620_v53 = vld [vmem:[%s3552_s3 + $0x20] sm:$0xff] }
  0x24   :  { %474 = vmatpush.bf16.msrb.mxu0 %v2258_v28  ;;  %45 = vst [vmem:[#allocation3 + $0x48] sm:$0xff] %v2748_v63  ;;  %461 = vmatpush.bf16.msra.mxu3 %v2146_v49  ;;  %v2287_v4 = vld [vmem:[%s3550_s2 + $0x138] sm:$0xf0]  ;;  %v2588_v7 = vld [vmem:[%s3550_s2 + $0xa4] sm:$0xf]  ;;  %v82_v23 = vld [vmem:[%s3551_s0 + $0x12] sm:$0xff] }
  0x25   :  { %493 = vmatpush.bf16.msrb.mxu1 %v2322_v34  ;;  %46 = vst [vmem:[#allocation3 + $0x50] sm:$0xff] %v2748_v63  ;;  %v2290_v6 = vor.u32 %v2606_v3, %v2287_v4  ;;  %v2215_v8 = vld [vmem:[%s3550_s2 + $0xa8] sm:$0xf0]  ;;  %v2604_v9 = vld [vmem:[%s3550_s2 + $0x124] sm:$0xf]  ;;  %v2622_v49 = vld [vmem:[%s3552_s3 + $0x30] sm:$0xff] }
  0x26   :  { %47 = vst [vmem:[#allocation3 + $0x58] sm:$0xff] %v2748_v63  ;;  %v2279_v10 = vld [vmem:[%s3550_s2 + $0x128] sm:$0xf0]  ;;  %v2218_v13 = vor.u32 %v2588_v7, %v2215_v8  ;;  %v2207_v16 = vld [vmem:[%s3550_s2 + $0x98] sm:$0xf0]  ;;  %1033 = vmatpush.bf16.msrb.mxu2 %v2623_v47  ;;  %v2638_v50 = vld [vmem:[%s3552_s3 + $0xb0] sm:$0xff] }
  0x27   :  { %49 = vst [vmem:[#allocation3 + $0x68] sm:$0xff] %v2748_v63  ;;  %v71_v12 = vld [vmem:[%s3551_s0 + $0xa] sm:$0x3f]  ;;  %v2282_v15 = vor.u32 %v2604_v9, %v2279_v10  ;;  %v2602_v17 = vld [vmem:[%s3550_s2 + $0x114] sm:$0xf]  ;;  %v2636_v55 = vld [vmem:[%s3552_s3 + $0xa0] sm:$0xff] }
  0x28   :  { %475 = vmatpush.bf16.msrb.mxu0 %v2250_v37  ;;  %51 = vst [vmem:[#allocation3 + $0x78] sm:$0xff] %v2748_v63  ;;  %462 = vmatpush.bf16.msra.mxu3 %v2138_v60  ;;  %v2271_v18 = vld [vmem:[%s3550_s2 + $0x118] sm:$0xf0]  ;;  %v2584_v25 = vld [vmem:[%s3550_s2 + $0x84] sm:$0xf]  ;;  %v2618_v58 = vld [vmem:[%s3552_s3 + $0x10] sm:$0xff] }
  0x29   :  { %494 = vmatpush.bf16.msrb.mxu1 %v2314_v43  ;;  %53 = vst [vmem:[#allocation3 + $0x88] sm:$0xff] %v2748_v63  ;;  %v75_v19 = vld [vmem:[%s3551_s0 + $0x18] sm:$0x3f]  ;;  %v2274_v24 = vor.u32 %v2602_v17, %v2271_v18  ;;  %v2199_v26 = vld [vmem:[%s3550_s2 + $0x88] sm:$0xf0]  ;;  %v2630_v7 = vld [vmem:[%s3552_s3 + $0x70] sm:$0xff] }
  0x2a   :  { %54 = vst [vmem:[#allocation3 + $0x90] sm:$0xff] %v2748_v63  ;;  %v79_v21 = vld [vmem:[%s3551_s0 + $0x19] sm:$0x3f]  ;;  %v2263_v28 = vld [vmem:[%s3550_s2 + $0x108] sm:$0xf0]  ;;  %v2202_v31 = vor.u32 %v2584_v25, %v2199_v26  ;;  %1034 = vmatpush.bf16.msrb.mxu2 %v2622_v49  ;;  %v2628_v18 = vld [vmem:[%s3552_s3 + $0x60] sm:$0xff] }
  0x2b   :  { %55 = vst [vmem:[#allocation3 + $0x98] sm:$0xff] %v2748_v63  ;;  %463 = vmatmul.bf16.vlgmr.msra.gmra.mxu3 %v2981_v27  ;;  %v2600_v27 = vld [vmem:[%s3550_s2 + $0x104] sm:$0xf]  ;;  %v83_v29 = vld [vmem:[%s3551_s0 + $0x1a] sm:$0x3f]  ;;  %v2633_v0 = vld [vmem:[%s3552_s3 + $0x88] sm:$0xff] }
  0x2c   :  { %476 = vmatpush.bf16.msrb.mxu0 %v2242_v48  ;;  %56 = vst [vmem:[#allocation3 + $0xa0] sm:$0xff] %v2748_v63  ;;  %v2266_v33 = vor.u32 %v2600_v27, %v2263_v28  ;;  %v2639_v48 = vld [vmem:[%s3552_s3 + $0xb8] sm:$0xff]  ;;  %v3201_v62 = vld [vmem:[%s3553_s5] ss:$8 sm:$0x3] }
  0x2d   :  { %495 = vmatpush.bf16.msrb.mxu1 %v2306_v52  ;;  %57 = vst [vmem:[#allocation3 + $0xa8] sm:$0xff] %v2748_v63  ;;  %v2637_v52 = vld [vmem:[%s3552_s3 + $0xa8] sm:$0xff]  ;;  %v2619_v56 = vld [vmem:[%s3552_s3 + $0x18] sm:$0xff]  ;;  %v3213_v3 = vperm.slane %v3201_v62, 0  ;;  %v2652_v26 = vld [vmem:[%s3552_s3 + $0x120] sm:$0xff] }
  0x2e   :  { %58 = vst [vmem:[#allocation3 + $0xb0] sm:$0xff] %v2748_v63  ;;  %1035 = vmatpush.bf16.msrb.mxu2 %v2621_v51  ;;  %v2635_v57 = vld [vmem:[%s3552_s3 + $0x98] sm:$0xff]  ;;  %v2645_v17 = vld [vmem:[%s3552_s3 + $0xe8] sm:$0xff] }
  0x2f   :  { %59 = vst [vmem:[#allocation3 + $0xb8] sm:$0xff] %v2748_v63  ;;  %v2586_v63 = vld [vmem:[%s3550_s2 + $0x94] sm:$0xf]  ;;  %v2655_v8 = vld [vmem:[%s3552_s3 + $0x138] sm:$0xff]  ;;  %s2750_s2 = smov 68  }
  0x30   :  { %477 = vmatpush.bf16.msrb.mxu0 %v2234_v59  ;;  %68 = vst.msk [vmem:[#allocation2 + $0x8] sm:$0xff] %vm62_vm0, %v66_v5  ;;  %v2210_v22 = vor.u32 %v2586_v63, %v2207_v16  ;;  %v2634_v59 = vld [vmem:[%s3552_s3 + $0x90] sm:$0xff]  ;;  %v2632_v5 = vld [vmem:[%s3552_s3 + $0x80] sm:$0xff]  ;;  %v2627_v25 = vld [vmem:[%s3552_s3 + $0x58] sm:$0xff] }
  0x31   :  { %496 = vmatpush.bf16.msrb.mxu1 %v2298_v61  ;;  %69 = vst.msk [vmem:[#allocation2 + $0x20] sm:$0x3f] %vm64_vm1, %v67_v1  ;;  %v2617_v61 = vld [vmem:[%s3552_s3 + $0x8] sm:$0xff]  ;;  %v2631_v1 = vld [vmem:[%s3552_s3 + $0x78] sm:$0xff] }
  0x32   :  { %72 = vst.msk [vmem:[#allocation2 + $0x10] sm:$0xff] %vm62_vm0, %v70_v11  ;;  %1036 = vmatpush.bf16.msrb.mxu2 %v2620_v53  ;;  %1052 = vmatpush.bf16.msrb.mxu3 %v2631_v1  ;;  %v2646_v11 = vld [vmem:[%s3552_s3 + $0xf0] sm:$0xff]  ;;  %v2624_v53 = vld [vmem:[%s3552_s3 + $0x40] sm:$0xff] }
  0x33   :  { %73 = vst.msk [vmem:[#allocation2 + $0x28] sm:$0x3f] %vm64_vm1, %v71_v12  ;;  %v2629_v12 = vld [vmem:[%s3552_s3 + $0x68] sm:$0xff] }
  0x34   :  { %478 = vmatpush.bf16.msrb.mxu0 %v2226_v2  ;;  %76 = vst.msk [vmem:[#allocation2 + $0x30] sm:$0xff] %vm62_vm0, %v74_v14  ;;  %v2616_v2 = vld [vmem:[%s3552_s3] sm:$0xff] }
  0x35   :  { %497 = vmatpush.bf16.msrb.mxu1 %v2290_v6  ;;  %77 = vst.msk [vmem:[#allocation2 + $0x48] sm:$0x3f] %vm64_vm1, %v75_v19  ;;  %v2647_v6 = vld [vmem:[%s3552_s3 + $0xf8] sm:$0xff]  ;;  %v2653_v19 = vld [vmem:[%s3552_s3 + $0x128] sm:$0xff] }
  0x36   :  { %80 = vst.msk [vmem:[#allocation2 + $0x38] sm:$0xff] %vm62_vm0, %v78_v20  ;;  %1037 = vmatpush.bf16.msrb.mxu2 %v2619_v56  ;;  %1053 = vmatpush.bf16.msrb.mxu3 %v2630_v7 }
  0x37   :  { %v87_v30 = vld [vmem:[#allocation2 + $0x8] sm:$0xff]  ;;  %81 = vst.msk [vmem:[#allocation2 + $0x50] sm:$0x3f] %vm64_vm1, %v79_v21 }
  0x38   :  { %479 = vmatpush.bf16.msrb.mxu0 %v2218_v13  ;;  %v90_v32 = vld [vmem:[#allocation2 + $0x20] sm:$0xff]  ;;  %84 = vst.msk [vmem:[#allocation2 + $0x40] sm:$0xff] %vm62_vm0, %v82_v23  ;;  %v2654_v13 = vld [vmem:[%s3552_s3 + $0x130] sm:$0xff] }
  0x39   :  { %498 = vmatpush.bf16.msrb.mxu1 %v2282_v15  ;;  %v99_v34 = vpack.c.bf16 %v90_v32, %v87_v30  ;;  %v88_v35 = vld [vmem:[#allocation2 + $0x10] sm:$0xff]  ;;  %85 = vst.msk [vmem:[#allocation2 + $0x58] sm:$0x3f] %vm64_vm1, %v83_v29 }
  0x3a   :  { %v91_v36 = vld [vmem:[#allocation2 + $0x28] sm:$0xff]  ;;  %1038 = vmatpush.bf16.msrb.mxu2 %v2618_v58  ;;  %1054 = vmatpush.bf16.msrb.mxu3 %v2629_v12 }
  0x3b   :  { %425 = vmatmul.bf16.vlgmr.msra.gmra.mxu1 %v99_v34  ;;  %v100_v37 = vpack.c.bf16 %v91_v36, %v88_v35  ;;  %v92_v38 = vld [vmem:[#allocation2 + $0x30] sm:$0xff] }
  0x3c   :  { %480 = vmatpush.bf16.msrb.mxu0 %v2210_v22  ;;  %v95_v39 = vld [vmem:[#allocation2 + $0x48] sm:$0xff] }
  0x3d   :  { %499 = vmatpush.bf16.msrb.mxu1 %v2274_v24  ;;  %444 = vmatmul.bf16.vlgmr.msra.gmra.mxu2 %v100_v37  ;;  %v101_v40 = vpack.c.bf16 %v95_v39, %v92_v38  ;;  %v93_v41 = vld [vmem:[#allocation2 + $0x38] sm:$0xff]  ;;  %v2644_v24 = vld [vmem:[%s3552_s3 + $0xe0] sm:$0xff] }
  0x3e   :  { %v96_v42 = vld [vmem:[#allocation2 + $0x50] sm:$0xff]  ;;  %1039 = vmatpush.bf16.msrb.mxu2 %v2617_v61  ;;  %1055 = vmatpush.bf16.msrb.mxu3 %v2628_v18 }
  0x3f   :  { %411 = vmatmul.bf16.gmra.mxu0 %v101_v40  ;;  %468 = vmatmul.bf16.gmra.mxu3 %v101_v40  ;;  %v94_v43 = vld [vmem:[#allocation2 + $0x40] sm:$0xff]  ;;  %v102_v45 = vpack.c.bf16 %v96_v42, %v93_v41  ;;  %v3271_v41 = vperm.slane %v3201_v62, 1  ;;  %v2642_v42 = vld [vmem:[%s3552_s3 + $0xd0] sm:$0xff] }
  0x40   :  { %481 = vmatpush.bf16.msrb.mxu0 %v2202_v31  ;;  %v97_v44 = vld [vmem:[#allocation2 + $0x58] sm:$0xff] }
  0x41   :  { %500 = vmatpush.bf16.msrb.mxu1 %v2266_v33  ;;  %v103_v46 = vpack.c.bf16 %v97_v44, %v94_v43  ;;  %v2643_v31 = vld [vmem:[%s3552_s3 + $0xd8] sm:$0xff]  ;;  %v2626_v33 = vld [vmem:[%s3552_s3 + $0x50] sm:$0xff] }
  0x42   :  { %1040 = vmatpush.bf16.msrb.mxu2 %v2616_v2  ;;  %1056 = vmatpush.bf16.msrb.mxu3 %v2627_v25 }
  0x44   :  { %1071 = vmatpush.bf16.msra.mxu0 %v2639_v48  ;;  %v2641_v48 = vld [vmem:[%s3552_s3 + $0xc8] sm:$0xff] }
  0x45   :  { %1090 = vmatpush.bf16.msra.mxu1 %v2647_v6 }
  0x46   :  { %1109 = vmatpush.bf16.msra.mxu2 %v2655_v8  ;;  %1057 = vmatpush.bf16.msrb.mxu3 %v2626_v33 }
  0x48   :  { %1072 = vmatpush.bf16.msra.mxu0 %v2638_v50 }
  0x49   :  { %1091 = vmatpush.bf16.msra.mxu1 %v2646_v11 }
  0x4a   :  { %1110 = vmatpush.bf16.msra.mxu2 %v2654_v13 }
  0x4b   :  { %430 = vmatmul.bf16.gmra.mxu1 %v102_v45 }
  0x4c   :  { %1073 = vmatpush.bf16.msra.mxu0 %v2637_v52 }
  0x4d   :  { %449 = vmatmul.bf16.gmra.mxu2 %v103_v46  ;;  %1092 = vmatpush.bf16.msra.mxu1 %v2645_v17 }
  0x4e   :  { %1111 = vmatpush.bf16.msra.mxu2 %v2653_v19 }
  0x4f   :  { %482 = vmatmul.bf16.vlgmr.msrb.gmra.mxu0 %v99_v34  ;;  %v2651_v34 = vld [vmem:[%s3552_s3 + $0x118] sm:$0xff] }
  0x50   :  { %1074 = vmatpush.bf16.msra.mxu0 %v2636_v55 }
  0x51   :  { %1093 = vmatpush.bf16.msra.mxu1 %v2644_v24 }
  0x52   :  { %1112 = vmatpush.bf16.msra.mxu2 %v2652_v26 }
  0x54   :  { %1075 = vmatpush.bf16.msra.mxu0 %v2635_v57 }
  0x55   :  { %1094 = vmatpush.bf16.msra.mxu1 %v2643_v31 }
  0x56   :  { %1113 = vmatpush.bf16.msra.mxu2 %v2651_v34 }
  0x58   :  { %1076 = vmatpush.bf16.msra.mxu0 %v2634_v59 }
  0x59   :  { %1095 = vmatpush.bf16.msra.mxu1 %v2642_v42 }
  0x5b   :  { %501 = vmatmul.bf16.vlgmr.msrb.gmra.mxu1 %v100_v37 }
  0x5c   :  { %1077 = vmatpush.bf16.msra.mxu0 %v2633_v0  ;;  %v2640_v0 = vld [vmem:[%s3552_s3 + $0xc0] sm:$0xff] }
  0x5d   :  { %1096 = vmatpush.bf16.msra.mxu1 %v2641_v48 }
  0x5f   :  { %487 = vmatmul.bf16.gmra.mxu0 %v102_v45  ;;  %v2625_v45 = vld [vmem:[%s3552_s3 + $0x48] sm:$0xff] }
  0x60   :  { %1078 = vmatpush.bf16.msra.mxu0 %v2632_v5  ;;  %1058 = vmatpush.bf16.msrb.mxu3 %v2625_v45 }
  0x61   :  { %1097 = vmatpush.bf16.msra.mxu1 %v2640_v0 }
  0x64   :  { %1059 = vmatpush.bf16.msrb.mxu3 %v2624_v53 }
  0x6b   :  { %506 = vmatmul.bf16.gmra.mxu1 %v103_v46  ;;  %v2650_v46 = vld [vmem:[%s3552_s3 + $0x110] sm:$0xff] }
  0x6c   :  { %1114 = vmatpush.bf16.msra.mxu2 %v2650_v46 }
  0xa0   :  { %v407_v54 = vpop.f32.mrf.mxu0 }
  0xa1   :  { %v408_v9 = vadd.f32 %v407_v54, %v3213_v3  ;;  %v2649_v54 = vld [vmem:[%s3552_s3 + $0x108] sm:$0xff] }
  0xa2   :  { %1115 = vmatpush.bf16.msra.mxu2 %v2649_v54 }
  0xa8   :  { %v409_v60 = vpop.f32.mrf.mxu0 }
  0xa9   :  { %v410_v21 = vadd.f32 %v409_v60, %v3213_v3 }
  0xae   :  { %v464_v32 = vpop.f32.mrf.mxu3 }
  0xaf   :  { %v465_v56 = vadd.f32 %v464_v32, %v3271_v41 }
  0xb6   :  { %v466_v59 = vpop.f32.mrf.mxu3 }
  0xb7   :  { %v467_v12 = vadd.f32 %v466_v59, %v3271_v41  ;;  %v2657_v59 = vld [vmem:[%s3552_s3 + $0x148] sm:$0xff] }
  0xb8   :  { %v426_v4 = vpop.f32.mrf.mxu1 }
  0xb9   :  { %v427_v14 = vadd.f32 %v426_v4, %v408_v9  ;;  %v2663_v4 = vld [vmem:[%s3552_s3 + $0x178] sm:$0xff] }
  0xba   :  { %1128 = vmatpush.bf16.msra.mxu3 %v2663_v4 }
  0xbc   :  { %v412_v10 = vpop.f32.mrf.mxu0 }
  0xbd   :  { %v413_v36 = vadd.f32 %v412_v10, %v3213_v3 }
  0xc0   :  { %v445_v15 = vpop.f32.mrf.mxu2  ;;  %v428_v63 = vpop.f32.mrf.mxu1 }
  0xc1   :  { %v446_v16 = vadd.f32 %v445_v15, %v427_v14  ;;  %v429_v27 = vadd.f32 %v428_v63, %v410_v21  ;;  %v2662_v15 = vld [vmem:[%s3552_s3 + $0x170] sm:$0xff] }
  0xc2   :  { %1129 = vmatpush.bf16.msra.mxu3 %v2662_v15 }
  0xc3   :  { %vm512_vm2 = vcmp.gt.f32.partialorder %v446_v16, 0.0  ;;  %v520_v20 = vmul.f32 0.01, %v446_v16 }
  0xc4   :  { %v414_v22 = vpop.f32.mrf.mxu0 }
  0xc5   :  { %v3247_v23 = vsel %vm512_vm2, %v446_v16, %v520_v20  ;;  %v415_v58 = vadd.f32 %v414_v22, %v3213_v3  ;;  %v2648_v3 = vld [vmem:[%s3552_s3 + $0x100] sm:$0xff]  ;;  %v469_v22 = vpop.f32.mrf.mxu3  ;;  %vm1174_vm2 = vcmask 195584  }
  0xc6   :  { %v547_v38 = vrot.slane %v3247_v23, 1  ;;  %v562_v39 = vrot.slane %v3247_v23, 2  ;;  %1116 = vmatpush.bf16.msra.mxu2 %v2648_v3 }
  0xc8   :  { %v447_v28 = vpop.f32.mrf.mxu2  ;;  %v431_v29 = vpop.f32.mrf.mxu1 }
  0xc9   :  { %v448_v30 = vadd.f32 %v447_v28, %v429_v27  ;;  %v432_v47 = vadd.f32 %v431_v29, %v413_v36  ;;  %v470_v28 = vadd.f32 %v469_v22, %v3271_v41  ;;  %v3368_v22 = vld [vmem:[%s3554_s4 + $0x18] sm:$0xff] }
  0xcb   :  { %vm514_vm3 = vcmp.gt.f32.partialorder %v448_v30, 0.0  ;;  %v522_v35 = vmul.f32 0.01, %v448_v30 }
  0xcc   :  { %v483_v37 = vpop.f32.mrf.mxu0 }
  0xcd   :  { %v530_v40 = vsel %vm514_vm3, %v448_v30, %v522_v35  ;;  %v484_v62 = vadd.f32 %v483_v37, %v465_v56  ;;  %v2660_v30 = vld [vmem:[%s3552_s3 + $0x160] sm:$0xff]  ;;  %v471_v45 = vpop.f32.mrf.mxu3 }
  0xce   :  { %539 = vst [vmem:[#allocation3 + $0x30] sm:$0xf] %v530_v40  ;;  %v548_v43 = vrot.slane %v530_v40, 1  ;;  %v563_v44 = vrot.slane %v530_v40, 2  ;;  %v2659_v40 = vld [vmem:[%s3552_s3 + $0x158] sm:$0xff] }
  0xd0   :  { %v549_v49 = vsel %vm546_vm4, %v547_v38, %v548_v43  ;;  %559 = vst [vmem:[#allocation3 + $0x40] sm:$0xf] %v548_v43  ;;  %v3287_v50 = vsel %vm561_vm5, %v562_v39, %v563_v44  ;;  %v450_v51 = vpop.f32.mrf.mxu2  ;;  %v433_v52 = vpop.f32.mrf.mxu1 }
  0xd1   :  { %v451_v55 = vadd.f32 %v450_v51, %v432_v47  ;;  %574 = vst [vmem:[#allocation3 + $0x50] sm:$0xf] %v563_v44  ;;  %v434_v5 = vadd.f32 %v433_v52, %v415_v58  ;;  %v2658_v51 = vld [vmem:[%s3552_s3 + $0x150] sm:$0xff]  ;;  %v472_v52 = vadd.f32 %v471_v45, %v3271_v41 }
  0xd3   :  { %vm516_vm6 = vcmp.gt.f32.partialorder %v451_v55, 0.0  ;;  %v524_v57 = vmul.f32 0.01, %v451_v55 }
  0xd4   :  { %v485_v2 = vpop.f32.mrf.mxu0 }
  0xd5   :  { %v3297_v60 = vsel %vm516_vm6, %v451_v55, %v524_v57  ;;  %v618_v61 = vld [vmem:[#allocation3 + $0x30] sm:$0xff]  ;;  %v486_v18 = vadd.f32 %v485_v2, %v467_v12  ;;  %v2656_v2 = vld [vmem:[%s3552_s3 + $0x140] sm:$0xff] }
  0xd6   :  { %v636_v1 = vpack.c.bf16 %v618_v61, %v3247_v23  ;;  %v584_v63 = vrot.slane %v3297_v60, 1  ;;  %v598_v19 = vrot.slane %v3297_v60, 2  ;;  %v2661_v23 = vld [vmem:[%s3552_s3 + $0x168] sm:$0xff] }
  0xd7   :  { %v620_v6 = vld [vmem:[#allocation3 + $0x40] sm:$0xff]  ;;  %1130 = vmatpush.bf16.msra.mxu3 %v2661_v23 }
  0xd8   :  { %v452_v7 = vpop.f32.mrf.mxu2  ;;  %1041 = vmatmul.bf16.vlgmr.msrb.gmra.mxu2 %v636_v1  ;;  %v502_v8 = vpop.f32.mrf.mxu1  ;;  %v638_v9 = vpack.c.bf16 %v620_v6, %v549_v49  ;;  %v622_v1 = vld [vmem:[#allocation3 + $0x50] sm:$0xff] }
  0xd9   :  { %v453_v10 = vadd.f32 %v452_v7, %v434_v5  ;;  %v503_v11 = vadd.f32 %v502_v8, %v484_v62  ;;  %v640_v5 = vpack.c.bf16 %v622_v1, %v3287_v50 }
  0xda   :  { %1079 = vmatmul.bf16.vlgmr.msra.gmra.mxu0 %v638_v9 }
  0xdb   :  { %vm518_vm7 = vcmp.gt.f32.partialorder %v453_v10, 0.0  ;;  %v526_v13 = vmul.f32 0.01, %v453_v10  ;;  %vm513_vm8 = vcmp.gt.f32.partialorder %v503_v11, 0.0  ;;  %v521_v14 = vmul.f32 0.01, %v503_v11  ;;  %1131 = vmatpush.bf16.msra.mxu3 %v2660_v30 }
  0xdc   :  { %v488_v27 = vpop.f32.mrf.mxu0  ;;  %v2749_v30 = vmov 0  }
  0xdd   :  { %v534_v16 = vsel %vm518_vm7, %v453_v10, %v526_v13  ;;  %v529_v17 = vsel %vm513_vm8, %v503_v11, %v521_v14  ;;  %v489_v35 = vadd.f32 %v488_v27, %v470_v28 }
  0xde   :  { %578 = vst [vmem:[#allocation3 + $0x90] sm:$0xf] %v534_v16  ;;  %v585_v20 = vrot.slane %v534_v16, 1  ;;  %v599_v21 = vrot.slane %v534_v16, 2  ;;  %v550_v32 = vrot.slane %v529_v17, 1  ;;  %v565_v36 = vrot.slane %v529_v17, 2 }
  0xdf   :  { %538 = vst.msk [vmem:[#allocation3 + $0x8] sm:$0xff] %vm537_vm9, %v529_v17  ;;  %1132 = vmatpush.bf16.msra.mxu3 %v2659_v40  ;;  %v2664_v40 = vld [vmem:[%s3554_s4] sm:$0xff] }
  0xe0   :  { %v586_v24 = vsel %vm546_vm4, %v584_v63, %v585_v20  ;;  %596 = vst [vmem:[#allocation3 + $0xa0] sm:$0xf] %v585_v20  ;;  %v3321_v25 = vsel %vm561_vm5, %v598_v19, %v599_v21  ;;  %v504_v26 = vpop.f32.mrf.mxu1  ;;  %v1213_v63 = vld [vmem:[%s3554_s4 + $0x20] sm:$0x1] }
  0xe1   :  { %v505_v29 = vadd.f32 %v504_v26, %v486_v18  ;;  %610 = vst [vmem:[#allocation3 + $0xb0] sm:$0xf] %v599_v21  ;;  %v1225_v17 = vunpack.c.l.b16 %v1213_v63 }
  0xe3   :  { %vm515_vm10 = vcmp.gt.f32.partialorder %v505_v29, 0.0  ;;  %v523_v31 = vmul.f32 0.01, %v505_v29  ;;  %1133 = vmatpush.bf16.msra.mxu3 %v2658_v51  ;;  %v1228_v19 = vpack.c.b16 %v1225_v17, %v1225_v17 }
  0xe4   :  { %v490_v49 = vpop.f32.mrf.mxu0 }
  0xe5   :  { %v531_v33 = vsel %vm515_vm10, %v505_v29, %v523_v31  ;;  %v630_v34 = vld [vmem:[#allocation3 + $0x90] sm:$0xff]  ;;  %v491_v55 = vadd.f32 %v490_v49, %v472_v52  ;;  %v3361_v20 = vsel %vm1235_vm14, %v1228_v19, 0  ;;  %v1214_v31 = vld [vmem:[%s3553_s5 + $0x3] ss:$0 sm:$0xff]  ;;  %vm1231_vm10 = vcmask 277504  }
  0xe6   :  { %541 = vst.msk [vmem:[#allocation3 + $0x38] sm:$0xf] %vm540_vm11, %v531_v33  ;;  %v551_v37 = vrot.slane %v531_v33, 1  ;;  %v566_v38 = vrot.slane %v531_v33, 2  ;;  %v642_v39 = vpack.c.bf16 %v630_v34, %v3297_v60  ;;  %v613_v56 = vld [vmem:[#allocation3 + $0x8] sm:$0xff]  ;;  %1244 = vmatpush.bf16.msrb.mxu1 %v3361_v20  ;;  %1310 = vmatpush.bf16.msrb.mxu2 %v3361_v20  ;;  %v3378_v29 = vld [vmem:[%s3554_s4 + $0x10] sm:$0xff] }
  0xe7   :  { %v632_v42 = vld [vmem:[#allocation3 + $0xa0] sm:$0xff]  ;;  %1134 = vmatpush.bf16.msra.mxu3 %v2657_v59  ;;  %1273 = vrot.lane.b32.xlu0 %v1214_v31, %s2750_s2  ;;  %v1163_v33 = vld [vmem:[%s3554_s4 + $0x8] sm:$0xf] }
  0xe8   :  { %v552_v43 = vsel %vm546_vm4, %v550_v32, %v551_v37  ;;  %560 = vst.msk [vmem:[#allocation3 + $0x48] sm:$0xf] %vm540_vm11, %v551_v37  ;;  %v567_v44 = vsel %vm561_vm5, %v565_v36, %v566_v38  ;;  %1046 = vmatmul.bf16.gmra.mxu2 %v642_v39  ;;  %v507_v46 = vpop.f32.mrf.mxu1  ;;  %v644_v47 = vpack.c.bf16 %v632_v42, %v586_v24  ;;  %v634_v18 = vld [vmem:[#allocation3 + $0xb0] sm:$0xff]  ;;  %v1170_v34 = vunpack.c.l.b16 %v1163_v33 }
  0xe9   :  { %558 = vst.msk [vmem:[#allocation3 + $0x18] sm:$0xff] %vm537_vm9, %v552_v43  ;;  %v508_v48 = vadd.f32 %v507_v46, %v489_v35  ;;  %v646_v21 = vpack.c.bf16 %v634_v18, %v3321_v25  ;;  %v744_v46 = vld [vmem:[%s3553_s5 + $0x1] ss:$0 sm:$0xff] }
  0xea   :  { %573 = vst.msk [vmem:[#allocation3 + $0x28] sm:$0xff] %vm537_vm9, %v567_v44  ;;  %1084 = vmatmul.bf16.gmra.mxu0 %v644_v47  ;;  %1245 = vmatpush.bf16.msrb.mxu1 %v3368_v22  ;;  %v1172_v35 = vpack.c.b16 %v1170_v34, %v1170_v34 }
  0xeb   :  { %575 = vst.msk [vmem:[#allocation3 + $0x58] sm:$0xf] %vm540_vm11, %v566_v38  ;;  %vm517_vm12 = vcmp.gt.f32.partialorder %v508_v48, 0.0  ;;  %v525_v53 = vmul.f32 0.01, %v508_v48  ;;  %1135 = vmatpush.bf16.msra.mxu3 %v2656_v2  ;;  %1311 = vmatpush.bf16.msrb.mxu2 %v3368_v22 }
  0xec   :  { %v1183_v36 = vsel %vm1181_vm15, %v1172_v35, 0 }
  0xed   :  { %v533_v54 = vsel %vm517_vm12, %v508_v48, %v525_v53  ;;  %v619_v57 = vld [vmem:[#allocation3 + $0x38] sm:$0xff]  ;;  %1191 = vmatpush.bf16.msrb.mxu0 %v1183_v36 }
  0xee   :  { %577 = vst.msk [vmem:[#allocation3 + $0x68] sm:$0xff] %vm537_vm9, %v533_v54  ;;  %v637_v58 = vpack.c.bf16 %v619_v57, %v613_v56  ;;  %v587_v6 = vrot.slane %v533_v54, 1  ;;  %v601_v7 = vrot.slane %v533_v54, 2  ;;  %1246 = vmatpush.bf16.msrb.mxu1 %v3378_v29 }
  0xef   :  { %v621_v60 = vld [vmem:[#allocation3 + $0x48] sm:$0xff]  ;;  %1312 = vmatpush.bf16.msrb.mxu2 %v3378_v29 }
  0xf0   :  { %v509_v61 = vpop.f32.mrf.mxu1  ;;  %1060 = vmatmul.bf16.vlgmr.msrb.gmra.mxu3 %v637_v58  ;;  %v615_v62 = vld [vmem:[#allocation3 + $0x18] sm:$0xff] }
  0xf1   :  { %v510_v0 = vadd.f32 %v509_v61, %v491_v55  ;;  %v639_v41 = vpack.c.bf16 %v621_v60, %v615_v62  ;;  %1372 = vmatpush.bf16.msrb.mxu3 %v3361_v20  ;;  %v617_v23 = vld [vmem:[#allocation3 + $0x28] sm:$0xff]  ;;  %1192 = vmatpush.bf16.msrb.mxu0 %v2664_v40  ;;  %v1164_v40 = vld [vmem:[%s3553_s5 + $0x2] ss:$0 sm:$0xff] }
  0xf2   :  { %v623_v24 = vld [vmem:[#allocation3 + $0x58] sm:$0xff] }
  0xf3   :  { %vm519_vm13 = vcmp.gt.f32.partialorder %v510_v0, 0.0  ;;  %v527_v4 = vmul.f32 0.01, %v510_v0  ;;  %1098 = vmatmul.bf16.vlgmr.msra.gmra.mxu1 %v639_v41  ;;  %v641_v25 = vpack.c.bf16 %v623_v24, %v617_v23 }
  0xf4   :  { %1434 = vmatpush.bf16.msra.mxu1 %v3361_v20 }
  0xf5   :  { %v535_v3 = vsel %vm519_vm13, %v510_v0, %v527_v4  ;;  %v625_v50 = vld [vmem:[#allocation3 + $0x68] sm:$0xff]  ;;  %1373 = vmatpush.bf16.msrb.mxu3 %v3368_v22  ;;  %1620 = vmatpush.bf16.msra.mxu0 %v3361_v20 }
  0xf6   :  { %579 = vst.msk [vmem:[#allocation3 + $0x98] sm:$0xf] %vm540_vm11, %v535_v3  ;;  %v588_v8 = vrot.slane %v535_v3, 1  ;;  %v602_v9 = vrot.slane %v535_v3, 2 }
  0xf8   :  { %v589_v10 = vsel %vm546_vm4, %v587_v6, %v588_v8  ;;  %597 = vst.msk [vmem:[#allocation3 + $0xa8] sm:$0xf] %vm540_vm11, %v588_v8  ;;  %v603_v11 = vsel %vm561_vm5, %v601_v7, %v602_v9  ;;  %1117 = vmatmul.bf16.vlgmr.msra.gmra.mxu2 %v640_v5  ;;  %1435 = vmatpush.bf16.msra.mxu1 %v3368_v22  ;;  %vm1204_vm5 = vcmask 834560  }
  0xf9   :  { %595 = vst.msk [vmem:[#allocation3 + $0x78] sm:$0xff] %vm537_vm9, %v589_v10  ;;  %1374 = vmatpush.bf16.msrb.mxu3 %v3378_v29  ;;  %1496 = vmatpush.bf16.msra.mxu2 %v3361_v20 }
  0xfa   :  { %609 = vst.msk [vmem:[#allocation3 + $0x88] sm:$0xff] %vm537_vm9, %v603_v11  ;;  %1621 = vmatpush.bf16.msra.mxu0 %v3368_v22 }
  0xfb   :  { %611 = vst.msk [vmem:[#allocation3 + $0xb8] sm:$0xf] %vm540_vm11, %v602_v9 }
  0xfc   :  { %1436 = vmatpush.bf16.msra.mxu1 %v3378_v29 }
  0xfd   :  { %v631_v12 = vld [vmem:[#allocation3 + $0x98] sm:$0xff]  ;;  %1497 = vmatpush.bf16.msra.mxu2 %v3368_v22 }
  0xfe   :  { %v643_v13 = vpack.c.bf16 %v631_v12, %v625_v50  ;;  %1622 = vmatpush.bf16.msra.mxu0 %v3378_v29 }
  0xff   :  { %v633_v14 = vld [vmem:[#allocation3 + $0xa8] sm:$0xff] }
 0x100   :  { %1065 = vmatmul.bf16.gmra.mxu3 %v643_v13  ;;  %v627_v15 = vld [vmem:[#allocation3 + $0x78] sm:$0xff] }
 0x101   :  { %v645_v16 = vpack.c.bf16 %v633_v14, %v627_v15  ;;  %v629_v26 = vld [vmem:[#allocation3 + $0x88] sm:$0xff]  ;;  %1498 = vmatpush.bf16.msra.mxu2 %v3378_v29 }
 0x102   :  { %v635_v27 = vld [vmem:[#allocation3 + $0xb8] sm:$0xff] }
 0x103   :  { %1103 = vmatmul.bf16.gmra.mxu1 %v645_v16  ;;  %v647_v28 = vpack.c.bf16 %v635_v27, %v629_v26 }
 0x108   :  { %1122 = vmatmul.bf16.gmra.mxu2 %v646_v21 }
 0x110   :  { %1136 = vmatmul.bf16.vlgmr.msra.gmra.mxu3 %v641_v25 }
 0x111   :  { %1558 = vmatpush.bf16.msra.mxu3 %v3361_v20 }
 0x113   :  { %1247 = vmatmul.bf16.vlgmr.msrb.gmra.mxu1 %v2749_v30 }
 0x114   :  { %1682 = vmatpush.bf16.msrb.mxu1 %v3361_v20 }
 0x115   :  { %1559 = vmatpush.bf16.msra.mxu3 %v3368_v22 }
 0x118   :  { %1683 = vmatpush.bf16.msrb.mxu1 %v3368_v22 }
 0x119   :  { %1560 = vmatpush.bf16.msra.mxu3 %v3378_v29 }
 0x11c   :  { %1684 = vmatpush.bf16.msrb.mxu1 %v3378_v29 }
 0x120   :  { %1141 = vmatmul.bf16.gmra.mxu3 %v647_v28 }
 0x157   :  { %v1080_v44 = vpop.f32.mrf.mxu0 }
 0x15b   :  { %v1042_v32 = vpop.f32.mrf.mxu2 }
 0x15c   :  { %v1043_v48 = vadd.f32 %v1042_v32, %v744_v46 }
 0x15f   :  { %v1082_v54 = vpop.f32.mrf.mxu0 }
 0x163   :  { %v1044_v37 = vpop.f32.mrf.mxu2 }
 0x164   :  { %v1045_v53 = vadd.f32 %v1044_v37, %v744_v46 }
 0x167   :  { %v1085_v41 = vpop.f32.mrf.mxu0 }
 0x16b   :  { %v1047_v39 = vpop.f32.mrf.mxu2 }
 0x16c   :  { %v1048_v1 = vadd.f32 %v1047_v39, %v744_v46 }
 0x16f   :  { %v1087_v15 = vpop.f32.mrf.mxu0 }
 0x170   :  { %v1099_v47 = vpop.f32.mrf.mxu1 }
 0x173   :  { %v1061_v38 = vpop.f32.mrf.mxu3  ;;  %v1049_v43 = vpop.f32.mrf.mxu2 }
 0x174   :  { %v1062_v49 = vadd.f32 %v1061_v38, %v1043_v48  ;;  %v1050_v7 = vadd.f32 %v1049_v43, %v744_v46  ;;  %v3417_v38 = vpop.permute.xlu0 %1273 }
 0x176   :  { %v1081_v55 = vadd.f32 %v1080_v44, %v1062_v49 }
 0x178   :  { %v1101_v57 = vpop.f32.mrf.mxu1  ;;  %v1100_v58 = vadd.f32 %v1099_v47, %v1081_v55 }
 0x17b   :  { %v1063_v42 = vpop.f32.mrf.mxu3  ;;  %v1118_v51 = vpop.f32.mrf.mxu2 }
 0x17c   :  { %v1064_v56 = vadd.f32 %v1063_v42, %v1045_v53  ;;  %v1119_v62 = vadd.f32 %v1118_v51, %v1100_v58 }
 0x17e   :  { %v1083_v59 = vadd.f32 %v1082_v54, %v1064_v56 }
 0x180   :  { %v1102_v0 = vadd.f32 %v1101_v57, %v1083_v59  ;;  %v1104_v5 = vpop.f32.mrf.mxu1 }
 0x183   :  { %v1066_v45 = vpop.f32.mrf.mxu3  ;;  %v1120_v61 = vpop.f32.mrf.mxu2 }
 0x184   :  { %v1121_v4 = vadd.f32 %v1120_v61, %v1102_v0  ;;  %v1067_v3 = vadd.f32 %v1066_v45, %v1048_v1 }
 0x186   :  { %v1086_v10 = vadd.f32 %v1085_v41, %v1067_v3 }
 0x188   :  { %v1105_v16 = vadd.f32 %v1104_v5, %v1086_v10  ;;  %v1106_v19 = vpop.f32.mrf.mxu1 }
 0x18b   :  { %v1068_v52 = vpop.f32.mrf.mxu3  ;;  %v1123_v12 = vpop.f32.mrf.mxu2 }
 0x18c   :  { %v1069_v11 = vadd.f32 %v1068_v52, %v1050_v7  ;;  %v1124_v21 = vadd.f32 %v1123_v12, %v1105_v16 }
 0x18e   :  { %v1088_v17 = vadd.f32 %v1087_v15, %v1069_v11 }
 0x190   :  { %v1107_v23 = vadd.f32 %v1106_v19, %v1088_v17  ;;  %v1248_v36 = vpop.f32.mrf.mxu1 }
 0x191   :  { %v1276_v39 = vadd.f32 %v3417_v38, %v1248_v36 }
 0x193   :  { %v1137_v60 = vpop.f32.mrf.mxu3  ;;  %v1125_v25 = vpop.f32.mrf.mxu2  ;;  %1278 = vrot.lane.b32.xlu0 %v1276_v39, %s2751_s27 }
 0x194   :  { %v1138_v2 = vadd.f32 %v1137_v60, %v1119_v62  ;;  %v1126_v26 = vadd.f32 %v1125_v25, %v1107_v23 }
 0x196   :  { %v1151_v8 = vmul.f32 0.01, %v1138_v2  ;;  %vm1147_vm0 = vcmp.gt.f32.partialorder %v1138_v2, 0.0 }
 0x198   :  { %v1155_v13 = vsel %vm1147_vm0, %v1138_v2, %v1151_v8  ;;  %v1250_v37 = vpop.f32.mrf.mxu1 }
 0x19b   :  { %v1139_v6 = vpop.f32.mrf.mxu3 }
 0x19c   :  { %v1140_v9 = vadd.f32 %v1139_v6, %v1121_v4 }
 0x19e   :  { %vm1148_vm1 = vcmp.gt.f32.partialorder %v1140_v9, 0.0  ;;  %v1152_v50 = vmul.f32 0.01, %v1140_v9 }
 0x1a0   :  { %v1156_v14 = vsel %vm1148_vm1, %v1140_v9, %v1152_v50 }
 0x1a1   :  { %v1159_v63 = vpack.c.bf16 %v1156_v14, %v1155_v13 }
 0x1a3   :  { %v1142_v18 = vpop.f32.mrf.mxu3  ;;  %2519 = vmatmul.msk.bf16.vlgmr.msrb.gmra.mxu0 %vm1174_vm2, %v1159_v63 }
 0x1a4   :  { %1868 = vmatpush.bf16.msrb.mxu0 %v3361_v20  ;;  %v1143_v24 = vadd.f32 %v1142_v18, %v1124_v21 }
 0x1a6   :  { %v1153_v28 = vmul.f32 0.01, %v1143_v24  ;;  %vm1149_vm3 = vcmp.gt.f32.partialorder %v1143_v24, 0.0 }
 0x1a8   :  { %1869 = vmatpush.bf16.msrb.mxu0 %v3368_v22  ;;  %v1157_v33 = vsel %vm1149_vm3, %v1143_v24, %v1153_v28 }
 0x1ab   :  { %v1144_v27 = vpop.f32.mrf.mxu3 }
 0x1ac   :  { %v1145_v31 = vadd.f32 %v1144_v27, %v1126_v26  ;;  %1870 = vmatpush.bf16.msrb.mxu0 %v3378_v29 }
 0x1ae   :  { %vm1150_vm4 = vcmp.gt.f32.partialorder %v1145_v31, 0.0  ;;  %v1154_v32 = vmul.f32 0.01, %v1145_v31 }
 0x1b0   :  { %v1158_v34 = vsel %vm1150_vm4, %v1145_v31, %v1154_v32 }
 0x1b1   :  { %v1160_v35 = vpack.c.bf16 %v1158_v34, %v1157_v33 }
 0x1b3   :  { %2520 = vmatmul.msk.bf16.gmra.mxu0 %vm1174_vm2, %v1160_v35 }
 0x205   :  { %v1279_v0 = vpop.permute.xlu0 %1278 }
 0x220   :  { %v1194_v42 = vpop.f32.mrf.mxu0 }
 0x221   :  { %v1195_v43 = vadd.f32 %v1194_v42, %v1164_v40 }
 0x223   :  { %1205 = vst.msk [vmem:[#allocation4] sm:$0xff] %vm1204_vm5, %v1195_v43 }
 0x228   :  { %v1196_v44 = vpop.f32.mrf.mxu0 }
 0x229   :  { %v1197_v45 = vadd.f32 %v1196_v44, %v1164_v40 }
 0x22b   :  { %1206 = vst.msk [vmem:[#allocation4 + $0x8] sm:$0xff] %vm1204_vm5, %v1197_v45 }
 0x230   :  { %v1199_v46 = vpop.f32.mrf.mxu0 }
 0x231   :  { %v1200_v47 = vadd.f32 %v1199_v46, %v1164_v40 }
 0x233   :  { %1207 = vst.msk [vmem:[#allocation4 + $0x10] sm:$0xff] %vm1204_vm5, %v1200_v47 }
 0x238   :  { %v1201_v48 = vpop.f32.mrf.mxu0 }
 0x239   :  { %v1202_v49 = vadd.f32 %v1201_v48, %v1164_v40 }
 0x23a   :  { %v1215_v51 = vld [vmem:[#allocation4] ss:$16 sm:$0x3]  ;;  %v1297_v63 = vld [vmem:[#allocation4 + $0x1] ss:$16 sm:$0x3] }
 0x23b   :  { %1208 = vst.msk [vmem:[#allocation4 + $0x18] sm:$0xff] %vm1204_vm5, %v1202_v49  ;;  %v1252_v52 = vadd.f32 %v1248_v36, %v1215_v51 }
 0x23d   :  { %v2529_v53 = vmul.f32 -1.442695, %v1252_v52  ;;  %v1359_v52 = vld [vmem:[#allocation4 + $0x2] ss:$16 sm:$0x3] }
 0x23f   :  { %2676 = vpow2.f32 %v2529_v53 }
 0x245   :  { %v2677_v54 = vpop.eup %2676 }
 0x246   :  { %v1256_v55 = vadd.f32 1.0, %v2677_v54 }
 0x248   :  { %2678 = vrcp.f32 %v1256_v55  ;;  %v1268_v59 = vand.u32 2147483648, %v1256_v55  ;;  %v1266_v61 = vand.u32 2147483647, %v1256_v55  ;;  %vm1262_vm7 = vweird.f32 %v1256_v55 }
 0x24a   :  { %v1269_v41 = vor.u32 1.1754944e-38, %v1268_v59  ;;  %vm1267_vm9 = vcmp.eq.f32.partialorder %v1266_v61, 8.507059e+37 }
 0x24e   :  { %v2679_v56 = vpop.eup %2678 }
 0x24f   :  { %v1258_v57 = vmul.f32 %v2679_v56, %v1256_v55  ;;  %vm1263_vm6 = vweird.f32 %v2679_v56 }
 0x250   :  { %vm1264_vm8 = vmor %vm1262_vm7, %vm1263_vm6 }
 0x251   :  { %v1259_v58 = vsub.f32 1.0, %v1258_v57 }
 0x253   :  { %v1260_v60 = vmul.f32 %v2679_v56, %v1259_v58 }
 0x255   :  { %v1261_v62 = vadd.f32 %v2679_v56, %v1260_v60 }
 0x257   :  { %v1265_v1 = vsel %vm1264_vm8, %v2679_v56, %v1261_v62 }
 0x258   :  { %v1270_v2 = vsel %vm1267_vm9, %v1269_v41, %v1265_v1 }
 0x259   :  { %v1281_v4 = vmul.f32 %v1279_v0, %v1270_v2  ;;  %v1288_v7 = vsub.f32 1.0, %v1270_v2  ;;  %v1294_v9 = vmul.f32 0.0, %v1270_v2 }
 0x25b   :  { %1283 = vrot.lane.b32.xlu1 %v1281_v4, %s2750_s2 }
 0x2cd   :  { %v1284_v3 = vpop.permute.xlu1 %1283 }
 0x2ce   :  { %v1286_v5 = vadd.f32 %v1284_v3, %v1215_v51 }
 0x2d0   :  { %2680 = vtanh.f32 %v1286_v5 }
 0x2d6   :  { %v2681_v6 = vpop.eup %2680 }
 0x2d7   :  { %1290 = vrot.lane.b32.xlu1 %v2681_v6, %s2752_s30 }
 0x349   :  { %v1291_v8 = vpop.permute.xlu1 %1290 }
 0x34a   :  { %v1293_v10 = vmul.f32 %v1291_v8, %v1288_v7 }
 0x34c   :  { %v1295_v11 = vadd.f32 %v1294_v9, %v1293_v10 }
 0x34e   :  { %v1298_v50 = vpack.c.bf16 %v1295_v11, %v1295_v11 }
 0x350   :  { %1300 = vrot.lane.b32.xlu2 %v1298_v50, %s2752_s30 }
 0x3aa   :  { %v1301_v12 = vpop.permute.xlu2 %1300 }
 0x3ab   :  { %2530 = vmatmul.msk.bf16.vlgmr.msrb.gmra.mxu2 %vm1231_vm10, %v1301_v12 }
 0x3ac   :  { %1744 = vmatpush.bf16.msrb.mxu2 %v3361_v20 }
 0x3b0   :  { %1745 = vmatpush.bf16.msrb.mxu2 %v3368_v22 }
 0x3b4   :  { %1746 = vmatpush.bf16.msrb.mxu2 %v3378_v29 }
 0x42e   :  { %v1314_v13 = vpop.f32.mrf.mxu2 }
 0x42f   :  { %v1338_v14 = vadd.f32 %v1314_v13, %v3417_v38  ;;  %v1318_v16 = vadd.f32 %v1314_v13, %v1297_v63 }
 0x431   :  { %1340 = vrot.lane.b32.xlu2 %v1338_v14, %s2751_s27  ;;  %v2531_v17 = vmul.f32 -1.442695, %v1318_v16  ;;  %v1421_v16 = vld [vmem:[#allocation4 + $0x3] ss:$16 sm:$0x3] }
 0x433   :  { %2682 = vpow2.f32 %v2531_v17 }
 0x436   :  { %v1316_v15 = vpop.f32.mrf.mxu2 }
 0x439   :  { %v2683_v18 = vpop.eup %2682 }
 0x43a   :  { %v1322_v19 = vadd.f32 1.0, %v2683_v18 }
 0x43c   :  { %2684 = vrcp.f32 %v1322_v19  ;;  %v1334_v27 = vand.u32 2147483648, %v1322_v19  ;;  %vm1328_vm12 = vweird.f32 %v1322_v19  ;;  %v1332_v28 = vand.u32 2147483647, %v1322_v19 }
 0x43e   :  { %v1335_v32 = vor.u32 1.1754944e-38, %v1334_v27  ;;  %vm1333_vm15 = vcmp.eq.f32.partialorder %v1332_v28, 8.507059e+37 }
 0x442   :  { %v2685_v21 = vpop.eup %2684 }
 0x443   :  { %v1324_v23 = vmul.f32 %v2685_v21, %v1322_v19  ;;  %vm1329_vm11 = vweird.f32 %v2685_v21 }
 0x444   :  { %vm1330_vm13 = vmor %vm1328_vm12, %vm1329_vm11 }
 0x445   :  { %v1325_v24 = vsub.f32 1.0, %v1324_v23 }
 0x447   :  { %v1326_v25 = vmul.f32 %v2685_v21, %v1325_v24 }
 0x449   :  { %v1327_v26 = vadd.f32 %v2685_v21, %v1326_v25 }
 0x44b   :  { %v1331_v31 = vsel %vm1330_vm13, %v2685_v21, %v1327_v26 }
 0x44c   :  { %v1336_v34 = vsel %vm1333_vm15, %v1335_v32, %v1331_v31 }
 0x44d   :  { %v1350_v40 = vsub.f32 1.0, %v1336_v34  ;;  %v1356_v43 = vmul.f32 %v1336_v34, %v1295_v11 }
 0x48b   :  { %v1341_v33 = vpop.permute.xlu2 %1340 }
 0x48c   :  { %v1343_v35 = vmul.f32 %v1341_v33, %v1336_v34 }
 0x48e   :  { %1345 = vrot.lane.b32.xlu0 %v1343_v35, %s2750_s2 }
 0x500   :  { %v1346_v36 = vpop.permute.xlu0 %1345 }
 0x501   :  { %v1348_v37 = vadd.f32 %v1346_v36, %v1297_v63 }
 0x503   :  { %2686 = vtanh.f32 %v1348_v37 }
 0x509   :  { %v2687_v39 = vpop.eup %2686 }
 0x50a   :  { %1352 = vrot.lane.b32.xlu1 %v2687_v39, %s2752_s30 }
 0x57c   :  { %v1353_v42 = vpop.permute.xlu1 %1352 }
 0x57d   :  { %v1355_v44 = vmul.f32 %v1353_v42, %v1350_v40 }
 0x57f   :  { %v1357_v45 = vadd.f32 %v1356_v43, %v1355_v44 }
 0x581   :  { %v1360_v46 = vpack.c.bf16 %v1357_v45, %v1357_v45 }
 0x583   :  { %1362 = vrot.lane.b32.xlu2 %v1360_v46, %s2752_s30 }
 0x5dd   :  { %v1363_v47 = vpop.permute.xlu2 %1362 }
 0x5de   :  { %2532 = vmatmul.msk.bf16.vlgmr.msrb.gmra.mxu3 %vm1231_vm10, %v1363_v47 }
 0x5df   :  { %1806 = vmatpush.bf16.msrb.mxu3 %v3361_v20 }
 0x5e3   :  { %1807 = vmatpush.bf16.msrb.mxu3 %v3368_v22 }
 0x5e7   :  { %1808 = vmatpush.bf16.msrb.mxu3 %v3378_v29 }
 0x661   :  { %v1376_v48 = vpop.f32.mrf.mxu3 }
 0x662   :  { %v1400_v49 = vadd.f32 %v1376_v48, %v3417_v38  ;;  %v1380_v53 = vadd.f32 %v1376_v48, %v1359_v52  ;;  %v3461_v48 = vsel %vm1235_vm14, 65535, %v2749_v30 }
 0x664   :  { %1402 = vrot.lane.b32.xlu0 %v1400_v49, %s2751_s27  ;;  %v2533_v54 = vmul.f32 -1.442695, %v1380_v53 }
 0x666   :  { %2688 = vpow2.f32 %v2533_v54 }
 0x669   :  { %v1378_v51 = vpop.f32.mrf.mxu3 }
 0x66c   :  { %v2689_v55 = vpop.eup %2688 }
 0x66d   :  { %v1384_v56 = vadd.f32 1.0, %v2689_v55  ;;  %v1483_v55 = vld [vmem:[#allocation4 + $0x4] ss:$16 sm:$0x3] }
 0x66f   :  { %2690 = vrcp.f32 %v1384_v56  ;;  %v1396_v62 = vand.u32 2147483648, %v1384_v56  ;;  %vm1390_vm1 = vweird.f32 %v1384_v56  ;;  %v1394_v0 = vand.u32 2147483647, %v1384_v56 }
 0x671   :  { %v1397_v1 = vor.u32 1.1754944e-38, %v1396_v62  ;;  %vm1395_vm3 = vcmp.eq.f32.partialorder %v1394_v0, 8.507059e+37 }
 0x675   :  { %v2691_v57 = vpop.eup %2690 }
 0x676   :  { %v1386_v58 = vmul.f32 %v2691_v57, %v1384_v56  ;;  %vm1391_vm0 = vweird.f32 %v2691_v57 }
 0x677   :  { %vm1392_vm2 = vmor %vm1390_vm1, %vm1391_vm0 }
 0x678   :  { %v1387_v59 = vsub.f32 1.0, %v1386_v58 }
 0x67a   :  { %v1388_v60 = vmul.f32 %v2691_v57, %v1387_v59 }
 0x67c   :  { %v1389_v61 = vadd.f32 %v2691_v57, %v1388_v60 }
 0x67e   :  { %v1393_v41 = vsel %vm1392_vm2, %v2691_v57, %v1389_v61 }
 0x67f   :  { %v1398_v4 = vsel %vm1395_vm3, %v1397_v1, %v1393_v41 }
 0x680   :  { %v1412_v8 = vsub.f32 1.0, %v1398_v4  ;;  %v1418_v10 = vmul.f32 %v1398_v4, %v1357_v45  ;;  %v1990_v45 = vld [vmem:[%s3554_s4 + $0x48] sm:$0x1] }
 0x681   :  { %v1997_v46 = vunpack.c.l.b16 %v1990_v45 }
 0x683   :  { %v3457_v47 = vpack.c.b16 %v1997_v46, %v1997_v46 }
 0x685   :  { %v2008_v49 = vand.u32 %v3461_v48, %v3457_v47 }
 0x6d6   :  { %v1403_v2 = vpop.permute.xlu0 %1402 }
 0x6d7   :  { %v1405_v3 = vmul.f32 %v1403_v2, %v1398_v4 }
 0x6d9   :  { %1407 = vrot.lane.b32.xlu1 %v1405_v3, %s2750_s2 }
 0x74b   :  { %v1408_v5 = vpop.permute.xlu1 %1407 }
 0x74c   :  { %v1410_v6 = vadd.f32 %v1408_v5, %v1359_v52 }
 0x74e   :  { %2692 = vtanh.f32 %v1410_v6 }
 0x754   :  { %v2693_v7 = vpop.eup %2692 }
 0x755   :  { %1414 = vrot.lane.b32.xlu2 %v2693_v7, %s2752_s30 }
 0x7af   :  { %v1415_v9 = vpop.permute.xlu2 %1414 }
 0x7b0   :  { %v1417_v11 = vmul.f32 %v1415_v9, %v1412_v8 }
 0x7b2   :  { %v1419_v50 = vadd.f32 %v1418_v10, %v1417_v11 }
 0x7b4   :  { %v1422_v12 = vpack.c.bf16 %v1419_v50, %v1419_v50 }
 0x7b6   :  { %1424 = vrot.lane.b32.xlu0 %v1422_v12, %s2752_s30 }
 0x828   :  { %v1425_v13 = vpop.permute.xlu0 %1424 }
 0x829   :  { %2534 = vmatmul.msk.bf16.vlgmr.msra.gmra.mxu1 %vm1231_vm10, %v1425_v13 }
 0x82a   :  { %1930 = vmatpush.bf16.msra.mxu1 %v3361_v20 }
 0x82e   :  { %1931 = vmatpush.bf16.msra.mxu1 %v3368_v22 }
 0x832   :  { %1932 = vmatpush.bf16.msra.mxu1 %v3378_v29 }
 0x8a6   :  { %v1438_v14 = vpop.f32.mrf.mxu1 }
 0x8a7   :  { %v1462_v15 = vadd.f32 %v1438_v14, %v3417_v38  ;;  %v1442_v17 = vadd.f32 %v1438_v14, %v1421_v16 }
 0x8a9   :  { %1464 = vrot.lane.b32.xlu1 %v1462_v15, %s2751_s27  ;;  %v2535_v18 = vmul.f32 -1.442695, %v1442_v17 }
 0x8ab   :  { %2694 = vpow2.f32 %v2535_v18  ;;  %v1545_v18 = vld [vmem:[#allocation4 + $0x5] ss:$16 sm:$0x3] }
 0x8ae   :  { %v1440_v63 = vpop.f32.mrf.mxu1 }
 0x8b1   :  { %v2695_v19 = vpop.eup %2694 }
 0x8b2   :  { %v1446_v21 = vadd.f32 1.0, %v2695_v19 }
 0x8b4   :  { %2696 = vrcp.f32 %v1446_v21  ;;  %v1458_v29 = vand.u32 2147483648, %v1446_v21  ;;  %vm1452_vm5 = vweird.f32 %v1446_v21  ;;  %v1456_v26 = vand.u32 2147483647, %v1446_v21 }
 0x8b6   :  { %v1459_v28 = vor.u32 1.1754944e-38, %v1458_v29  ;;  %vm1457_vm7 = vcmp.eq.f32.partialorder %v1456_v26, 8.507059e+37 }
 0x8ba   :  { %v2697_v23 = vpop.eup %2696 }
 0x8bb   :  { %v1448_v24 = vmul.f32 %v2697_v23, %v1446_v21  ;;  %vm1453_vm4 = vweird.f32 %v2697_v23 }
 0x8bc   :  { %vm1454_vm6 = vmor %vm1452_vm5, %vm1453_vm4 }
 0x8bd   :  { %v1449_v20 = vsub.f32 1.0, %v1448_v24 }
 0x8bf   :  { %v1450_v25 = vmul.f32 %v2697_v23, %v1449_v20 }
 0x8c1   :  { %v1451_v22 = vadd.f32 %v2697_v23, %v1450_v25 }
 0x8c3   :  { %v1455_v27 = vsel %vm1454_vm6, %v2697_v23, %v1451_v22 }
 0x8c4   :  { %v1460_v32 = vsel %vm1457_vm7, %v1459_v28, %v1455_v27 }
 0x8c5   :  { %v1474_v37 = vsub.f32 1.0, %v1460_v32  ;;  %v1480_v40 = vmul.f32 %v1460_v32, %v1419_v50 }
 0x91b   :  { %v1465_v31 = vpop.permute.xlu1 %1464 }
 0x91c   :  { %v1467_v33 = vmul.f32 %v1465_v31, %v1460_v32 }
 0x91e   :  { %1469 = vrot.lane.b32.xlu2 %v1467_v33, %s2750_s2 }
 0x978   :  { %v1470_v34 = vpop.permute.xlu2 %1469 }
 0x979   :  { %v1472_v35 = vadd.f32 %v1470_v34, %v1421_v16 }
 0x97b   :  { %2698 = vtanh.f32 %v1472_v35 }
 0x981   :  { %v2699_v36 = vpop.eup %2698 }
 0x982   :  { %1476 = vrot.lane.b32.xlu0 %v2699_v36, %s2752_s30 }
 0x9f4   :  { %v1477_v39 = vpop.permute.xlu0 %1476 }
 0x9f5   :  { %v1479_v42 = vmul.f32 %v1477_v39, %v1474_v37 }
 0x9f7   :  { %v1481_v43 = vadd.f32 %v1480_v40, %v1479_v42 }
 0x9f9   :  { %v1484_v44 = vpack.c.bf16 %v1481_v43, %v1481_v43 }
 0x9fb   :  { %1486 = vrot.lane.b32.xlu1 %v1484_v44, %s2752_s30 }
 0xa6d   :  { %v1487_v51 = vpop.permute.xlu1 %1486 }
 0xa6e   :  { %2536 = vmatmul.msk.bf16.vlgmr.msra.gmra.mxu2 %vm1231_vm10, %v1487_v51 }
 0xa6f   :  { %2016 = vmatpush.bf16.msra.mxu2 %v2008_v49 }
 0xaf1   :  { %v1500_v52 = vpop.f32.mrf.mxu2 }
 0xaf2   :  { %v1524_v53 = vadd.f32 %v1500_v52, %v3417_v38  ;;  %v1504_v56 = vadd.f32 %v1500_v52, %v1483_v55 }
 0xaf4   :  { %1526 = vrot.lane.b32.xlu2 %v1524_v53, %s2751_s27  ;;  %v2537_v57 = vmul.f32 -1.442695, %v1504_v56 }
 0xaf6   :  { %2700 = vpow2.f32 %v2537_v57 }
 0xaf9   :  { %v1502_v54 = vpop.f32.mrf.mxu2 }
 0xafa   :  { %v1607_v54 = vld [vmem:[#allocation4 + $0x6] ss:$16 sm:$0x3] }
 0xafc   :  { %v2701_v58 = vpop.eup %2700 }
 0xafd   :  { %v1508_v30 = vadd.f32 1.0, %v2701_v58 }
 0xaff   :  { %2702 = vrcp.f32 %v1508_v30  ;;  %v1520_v41 = vand.u32 2147483648, %v1508_v30  ;;  %vm1514_vm9 = vweird.f32 %v1508_v30  ;;  %v1518_v1 = vand.u32 2147483647, %v1508_v30 }
 0xb01   :  { %v1521_v4 = vor.u32 1.1754944e-38, %v1520_v41  ;;  %vm1519_vm12 = vcmp.eq.f32.partialorder %v1518_v1, 8.507059e+37 }
 0xb05   :  { %v2703_v59 = vpop.eup %2702 }
 0xb06   :  { %v1510_v60 = vmul.f32 %v2703_v59, %v1508_v30  ;;  %vm1515_vm8 = vweird.f32 %v2703_v59 }
 0xb07   :  { %vm1516_vm11 = vmor %vm1514_vm9, %vm1515_vm8 }
 0xb08   :  { %v1511_v61 = vsub.f32 1.0, %v1510_v60 }
 0xb0a   :  { %v1512_v62 = vmul.f32 %v2703_v59, %v1511_v61 }
 0xb0c   :  { %v1513_v0 = vadd.f32 %v2703_v59, %v1512_v62 }
 0xb0e   :  { %v1517_v2 = vsel %vm1516_vm11, %v2703_v59, %v1513_v0 }
 0xb0f   :  { %v1522_v5 = vsel %vm1519_vm12, %v1521_v4, %v1517_v2 }
 0xb10   :  { %v1536_v10 = vsub.f32 1.0, %v1522_v5  ;;  %v1542_v50 = vmul.f32 %v1522_v5, %v1481_v43 }
 0xb4e   :  { %v1527_v3 = vpop.permute.xlu2 %1526 }
 0xb4f   :  { %v1529_v6 = vmul.f32 %v1527_v3, %v1522_v5 }
 0xb51   :  { %1531 = vrot.lane.b32.xlu0 %v1529_v6, %s2750_s2 }
 0xbc3   :  { %v1532_v7 = vpop.permute.xlu0 %1531 }
 0xbc4   :  { %v1534_v8 = vadd.f32 %v1532_v7, %v1483_v55 }
 0xbc6   :  { %2704 = vtanh.f32 %v1534_v8 }
 0xbcc   :  { %v2705_v9 = vpop.eup %2704 }
 0xbcd   :  { %1538 = vrot.lane.b32.xlu1 %v2705_v9, %s2752_s30 }
 0xc3f   :  { %v1539_v11 = vpop.permute.xlu1 %1538 }
 0xc40   :  { %v1541_v12 = vmul.f32 %v1539_v11, %v1536_v10 }
 0xc42   :  { %v1543_v13 = vadd.f32 %v1542_v50, %v1541_v12 }
 0xc44   :  { %v1546_v14 = vpack.c.bf16 %v1543_v13, %v1543_v13 }
 0xc46   :  { %1548 = vrot.lane.b32.xlu2 %v1546_v14, %s2752_s30 }
 0xca0   :  { %v1549_v15 = vpop.permute.xlu2 %1548 }
 0xca1   :  { %2538 = vmatmul.msk.bf16.vlgmr.msra.gmra.mxu3 %vm1231_vm10, %v1549_v15 }
 0xd24   :  { %v1562_v63 = vpop.f32.mrf.mxu3 }
 0xd25   :  { %v1586_v16 = vadd.f32 %v1562_v63, %v3417_v38  ;;  %v1566_v19 = vadd.f32 %v1562_v63, %v1545_v18 }
 0xd27   :  { %1588 = vrot.lane.b32.xlu0 %v1586_v16, %s2751_s27  ;;  %v2539_v21 = vmul.f32 -1.442695, %v1566_v19 }
 0xd29   :  { %2706 = vpow2.f32 %v2539_v21 }
 0xd2c   :  { %v1564_v17 = vpop.f32.mrf.mxu3 }
 0xd2d   :  { %v1669_v17 = vld [vmem:[#allocation4 + $0x7] ss:$16 sm:$0x3] }
 0xd2f   :  { %v2707_v23 = vpop.eup %2706 }
 0xd30   :  { %v1570_v24 = vadd.f32 1.0, %v2707_v23 }
 0xd32   :  { %2708 = vrcp.f32 %v1570_v24  ;;  %v1582_v27 = vand.u32 2147483648, %v1570_v24  ;;  %vm1576_vm15 = vweird.f32 %v1570_v24  ;;  %v1580_v28 = vand.u32 2147483647, %v1570_v24 }
 0xd34   :  { %v1583_v32 = vor.u32 1.1754944e-38, %v1582_v27  ;;  %vm1581_vm1 = vcmp.eq.f32.partialorder %v1580_v28, 8.507059e+37 }
 0xd38   :  { %v2709_v20 = vpop.eup %2708 }
 0xd39   :  { %v1572_v25 = vmul.f32 %v2709_v20, %v1570_v24  ;;  %vm1577_vm13 = vweird.f32 %v2709_v20 }
 0xd3a   :  { %vm1578_vm0 = vmor %vm1576_vm15, %vm1577_vm13 }
 0xd3b   :  { %v1573_v22 = vsub.f32 1.0, %v1572_v25 }
 0xd3d   :  { %v1574_v29 = vmul.f32 %v2709_v20, %v1573_v22 }
 0xd3f   :  { %v1575_v26 = vadd.f32 %v2709_v20, %v1574_v29 }
 0xd41   :  { %v1579_v31 = vsel %vm1578_vm0, %v2709_v20, %v1575_v26 }
 0xd42   :  { %v1584_v34 = vsel %vm1581_vm1, %v1583_v32, %v1579_v31 }
 0xd43   :  { %v1598_v40 = vsub.f32 1.0, %v1584_v34  ;;  %v1604_v43 = vmul.f32 %v1584_v34, %v1543_v13 }
 0xd99   :  { %v1589_v33 = vpop.permute.xlu0 %1588 }
 0xd9a   :  { %v1591_v35 = vmul.f32 %v1589_v33, %v1584_v34 }
 0xd9c   :  { %1593 = vrot.lane.b32.xlu1 %v1591_v35, %s2750_s2 }
 0xe0e   :  { %v1594_v36 = vpop.permute.xlu1 %1593 }
 0xe0f   :  { %v1596_v37 = vadd.f32 %v1594_v36, %v1545_v18 }
 0xe11   :  { %2710 = vtanh.f32 %v1596_v37 }
 0xe17   :  { %v2711_v39 = vpop.eup %2710 }
 0xe18   :  { %1600 = vrot.lane.b32.xlu2 %v2711_v39, %s2752_s30 }
 0xe72   :  { %v1601_v42 = vpop.permute.xlu2 %1600 }
 0xe73   :  { %v1603_v44 = vmul.f32 %v1601_v42, %v1598_v40 }
 0xe75   :  { %v1605_v45 = vadd.f32 %v1604_v43, %v1603_v44 }
 0xe77   :  { %v1608_v46 = vpack.c.bf16 %v1605_v45, %v1605_v45 }
 0xe79   :  { %1610 = vrot.lane.b32.xlu0 %v1608_v46, %s2752_s30 }
 0xeeb   :  { %v1611_v49 = vpop.permute.xlu0 %1610 }
 0xeec   :  { %2540 = vmatmul.msk.bf16.vlgmr.msra.gmra.mxu0 %vm1231_vm10, %v1611_v49 }
 0xf69   :  { %v1624_v51 = vpop.f32.mrf.mxu0 }
 0xf6a   :  { %v1648_v52 = vadd.f32 %v1624_v51, %v3417_v38  ;;  %v1628_v55 = vadd.f32 %v1624_v51, %v1607_v54 }
 0xf6c   :  { %1650 = vrot.lane.b32.xlu1 %v1648_v52, %s2751_s27  ;;  %v2541_v56 = vmul.f32 -1.442695, %v1628_v55 }
 0xf6e   :  { %2712 = vpow2.f32 %v2541_v56 }
 0xf71   :  { %v1626_v53 = vpop.f32.mrf.mxu0 }
 0xf72   :  { %v1731_v53 = vld [vmem:[#allocation4 + $0x8] ss:$16 sm:$0x3] }
 0xf74   :  { %v2713_v57 = vpop.eup %2712 }
 0xf75   :  { %v1632_v58 = vadd.f32 1.0, %v2713_v57 }
 0xf77   :  { %2714 = vrcp.f32 %v1632_v58  ;;  %v1644_v0 = vand.u32 2147483648, %v1632_v58  ;;  %vm1638_vm3 = vweird.f32 %v1632_v58  ;;  %v1642_v41 = vand.u32 2147483647, %v1632_v58 }
 0xf79   :  { %v1645_v2 = vor.u32 1.1754944e-38, %v1644_v0  ;;  %vm1643_vm5 = vcmp.eq.f32.partialorder %v1642_v41, 8.507059e+37 }
 0xf7d   :  { %v2715_v30 = vpop.eup %2714 }
 0xf7e   :  { %v1634_v59 = vmul.f32 %v2715_v30, %v1632_v58  ;;  %vm1639_vm2 = vweird.f32 %v2715_v30 }
 0xf7f   :  { %vm1640_vm4 = vmor %vm1638_vm3, %vm1639_vm2 }
 0xf80   :  { %v1635_v60 = vsub.f32 1.0, %v1634_v59 }
 0xf82   :  { %v1636_v61 = vmul.f32 %v2715_v30, %v1635_v60 }
 0xf84   :  { %v1637_v62 = vadd.f32 %v2715_v30, %v1636_v61 }
 0xf86   :  { %v1641_v1 = vsel %vm1640_vm4, %v2715_v30, %v1637_v62 }
 0xf87   :  { %v1646_v3 = vsel %vm1643_vm5, %v1645_v2, %v1641_v1 }
 0xf88   :  { %v1660_v9 = vsub.f32 1.0, %v1646_v3  ;;  %v1666_v11 = vmul.f32 %v1646_v3, %v1605_v45 }
 0xfde   :  { %v1651_v4 = vpop.permute.xlu1 %1650 }
 0xfdf   :  { %v1653_v5 = vmul.f32 %v1651_v4, %v1646_v3 }
 0xfe1   :  { %1655 = vrot.lane.b32.xlu2 %v1653_v5, %s2750_s2 }
0x103b   :  { %v1656_v6 = vpop.permute.xlu2 %1655 }
0x103c   :  { %v1658_v7 = vadd.f32 %v1656_v6, %v1607_v54 }
0x103e   :  { %2716 = vtanh.f32 %v1658_v7 }
0x1044   :  { %v2717_v8 = vpop.eup %2716 }
0x1045   :  { %1662 = vrot.lane.b32.xlu0 %v2717_v8, %s2752_s30 }
0x10b7   :  { %v1663_v10 = vpop.permute.xlu0 %1662 }
0x10b8   :  { %v1665_v50 = vmul.f32 %v1663_v10, %v1660_v9 }
0x10ba   :  { %v1667_v12 = vadd.f32 %v1666_v11, %v1665_v50 }
0x10bc   :  { %v1670_v13 = vpack.c.bf16 %v1667_v12, %v1667_v12 }
0x10be   :  { %1672 = vrot.lane.b32.xlu1 %v1670_v13, %s2752_s30 }
0x1130   :  { %v1673_v14 = vpop.permute.xlu1 %1672 }
0x1131   :  { %2542 = vmatmul.msk.bf16.vlgmr.msrb.gmra.mxu1 %vm1231_vm10, %v1673_v14 }
0x11ae   :  { %v1686_v15 = vpop.f32.mrf.mxu1 }
0x11af   :  { %v1710_v63 = vadd.f32 %v1686_v15, %v3417_v38  ;;  %v1690_v18 = vadd.f32 %v1686_v15, %v1669_v17 }
0x11b1   :  { %1712 = vrot.lane.b32.xlu2 %v1710_v63, %s2751_s27  ;;  %v2543_v19 = vmul.f32 -1.442695, %v1690_v18 }
0x11b3   :  { %2718 = vpow2.f32 %v2543_v19 }
0x11b6   :  { %v1688_v16 = vpop.f32.mrf.mxu1 }
0x11b7   :  { %v1793_v16 = vld [vmem:[#allocation4 + $0x9] ss:$16 sm:$0x3] }
0x11b9   :  { %v2719_v21 = vpop.eup %2718 }
0x11ba   :  { %v1694_v23 = vadd.f32 1.0, %v2719_v21 }
0x11bc   :  { %2720 = vrcp.f32 %v1694_v23  ;;  %v1706_v26 = vand.u32 2147483648, %v1694_v23  ;;  %vm1700_vm7 = vweird.f32 %v1694_v23  ;;  %v1704_v27 = vand.u32 2147483647, %v1694_v23 }
0x11be   :  { %v1707_v31 = vor.u32 1.1754944e-38, %v1706_v26  ;;  %vm1705_vm9 = vcmp.eq.f32.partialorder %v1704_v27, 8.507059e+37 }
0x11c2   :  { %v2721_v24 = vpop.eup %2720 }
0x11c3   :  { %v1696_v20 = vmul.f32 %v2721_v24, %v1694_v23  ;;  %vm1701_vm6 = vweird.f32 %v2721_v24 }
0x11c4   :  { %vm1702_vm8 = vmor %vm1700_vm7, %vm1701_vm6 }
0x11c5   :  { %v1697_v25 = vsub.f32 1.0, %v1696_v20 }
0x11c7   :  { %v1698_v22 = vmul.f32 %v2721_v24, %v1697_v25 }
0x11c9   :  { %v1699_v29 = vadd.f32 %v2721_v24, %v1698_v22 }
0x11cb   :  { %v1703_v28 = vsel %vm1702_vm8, %v2721_v24, %v1699_v29 }
0x11cc   :  { %v1708_v33 = vsel %vm1705_vm9, %v1707_v31, %v1703_v28 }
0x11cd   :  { %v1722_v39 = vsub.f32 1.0, %v1708_v33  ;;  %v1728_v42 = vmul.f32 %v1708_v33, %v1667_v12 }
0x120b   :  { %v1713_v32 = vpop.permute.xlu2 %1712 }
0x120c   :  { %v1715_v34 = vmul.f32 %v1713_v32, %v1708_v33 }
0x120e   :  { %1717 = vrot.lane.b32.xlu0 %v1715_v34, %s2750_s2 }
0x1280   :  { %v1718_v35 = vpop.permute.xlu0 %1717 }
0x1281   :  { %v1720_v36 = vadd.f32 %v1718_v35, %v1669_v17 }
0x1283   :  { %2722 = vtanh.f32 %v1720_v36 }
0x1289   :  { %v2723_v37 = vpop.eup %2722 }
0x128a   :  { %1724 = vrot.lane.b32.xlu1 %v2723_v37, %s2752_s30 }
0x12fc   :  { %v1725_v40 = vpop.permute.xlu1 %1724 }
0x12fd   :  { %v1727_v43 = vmul.f32 %v1725_v40, %v1722_v39 }
0x12ff   :  { %v1729_v44 = vadd.f32 %v1728_v42, %v1727_v43 }
0x1301   :  { %v1732_v45 = vpack.c.bf16 %v1729_v44, %v1729_v44 }
0x1303   :  { %1734 = vrot.lane.b32.xlu2 %v1732_v45, %s2752_s30 }
0x135d   :  { %v1735_v46 = vpop.permute.xlu2 %1734 }
0x135e   :  { %2544 = vmatmul.msk.bf16.vlgmr.msrb.gmra.mxu2 %vm1231_vm10, %v1735_v46 }
0x13e1   :  { %v1748_v49 = vpop.f32.mrf.mxu2 }
0x13e2   :  { %v1772_v51 = vadd.f32 %v1748_v49, %v3417_v38  ;;  %v1752_v54 = vadd.f32 %v1748_v49, %v1731_v53 }
0x13e4   :  { %1774 = vrot.lane.b32.xlu0 %v1772_v51, %s2751_s27  ;;  %v2545_v55 = vmul.f32 -1.442695, %v1752_v54 }
0x13e6   :  { %2724 = vpow2.f32 %v2545_v55 }
0x13e9   :  { %v1750_v52 = vpop.f32.mrf.mxu2 }
0x13ea   :  { %v1855_v52 = vld [vmem:[#allocation4 + $0xa] ss:$16 sm:$0x3] }
0x13ec   :  { %v2725_v56 = vpop.eup %2724 }
0x13ed   :  { %v1756_v57 = vadd.f32 1.0, %v2725_v56 }
0x13ef   :  { %2726 = vrcp.f32 %v1756_v57  ;;  %v1768_v62 = vand.u32 2147483648, %v1756_v57  ;;  %vm1762_vm12 = vweird.f32 %v1756_v57  ;;  %v1766_v0 = vand.u32 2147483647, %v1756_v57 }
0x13f1   :  { %v1769_v1 = vor.u32 1.1754944e-38, %v1768_v62  ;;  %vm1767_vm15 = vcmp.eq.f32.partialorder %v1766_v0, 8.507059e+37 }
0x13f5   :  { %v2727_v58 = vpop.eup %2726 }
0x13f6   :  { %v1758_v30 = vmul.f32 %v2727_v58, %v1756_v57  ;;  %vm1763_vm11 = vweird.f32 %v2727_v58 }
0x13f7   :  { %vm1764_vm13 = vmor %vm1762_vm12, %vm1763_vm11 }
0x13f8   :  { %v1759_v59 = vsub.f32 1.0, %v1758_v30 }
0x13fa   :  { %v1760_v60 = vmul.f32 %v2727_v58, %v1759_v59 }
0x13fc   :  { %v1761_v61 = vadd.f32 %v2727_v58, %v1760_v60 }
0x13fe   :  { %v1765_v41 = vsel %vm1764_vm13, %v2727_v58, %v1761_v61  ;;  %vm2001_vm13 = vcmask 138240  }
0x13ff   :  { %v1770_v4 = vsel %vm1767_vm15, %v1769_v1, %v1765_v41 }
0x1400   :  { %v1784_v8 = vsub.f32 1.0, %v1770_v4  ;;  %v1790_v10 = vmul.f32 %v1770_v4, %v1729_v44 }
0x1456   :  { %v1775_v2 = vpop.permute.xlu0 %1774 }
0x1457   :  { %v1777_v3 = vmul.f32 %v1775_v2, %v1770_v4 }
0x1459   :  { %1779 = vrot.lane.b32.xlu1 %v1777_v3, %s2750_s2 }
0x14cb   :  { %v1780_v5 = vpop.permute.xlu1 %1779 }
0x14cc   :  { %v1782_v6 = vadd.f32 %v1780_v5, %v1731_v53 }
0x14ce   :  { %2728 = vtanh.f32 %v1782_v6 }
0x14d4   :  { %v2729_v7 = vpop.eup %2728 }
0x14d5   :  { %1786 = vrot.lane.b32.xlu2 %v2729_v7, %s2752_s30 }
0x152f   :  { %v1787_v9 = vpop.permute.xlu2 %1786 }
0x1530   :  { %v1789_v11 = vmul.f32 %v1787_v9, %v1784_v8 }
0x1532   :  { %v1791_v50 = vadd.f32 %v1790_v10, %v1789_v11 }
0x1534   :  { %v1794_v12 = vpack.c.bf16 %v1791_v50, %v1791_v50 }
0x1536   :  { %1796 = vrot.lane.b32.xlu0 %v1794_v12, %s2752_s30 }
0x15a8   :  { %v1797_v13 = vpop.permute.xlu0 %1796 }
0x15a9   :  { %2546 = vmatmul.msk.bf16.vlgmr.msrb.gmra.mxu3 %vm1231_vm10, %v1797_v13 }
0x162c   :  { %v1810_v14 = vpop.f32.mrf.mxu3 }
0x162d   :  { %v1834_v15 = vadd.f32 %v1810_v14, %v3417_v38  ;;  %v1814_v17 = vadd.f32 %v1810_v14, %v1793_v16 }
0x162f   :  { %1836 = vrot.lane.b32.xlu1 %v1834_v15, %s2751_s27  ;;  %v2547_v18 = vmul.f32 -1.442695, %v1814_v17 }
0x1631   :  { %2730 = vpow2.f32 %v2547_v18 }
0x1634   :  { %v1812_v63 = vpop.f32.mrf.mxu3 }
0x1635   :  { %v1917_v63 = vld [vmem:[#allocation4 + $0xb] ss:$16 sm:$0x3] }
0x1637   :  { %v2731_v19 = vpop.eup %2730 }
0x1638   :  { %v1818_v21 = vadd.f32 1.0, %v2731_v19 }
0x163a   :  { %2732 = vrcp.f32 %v1818_v21  ;;  %v1830_v29 = vand.u32 2147483648, %v1818_v21  ;;  %vm1824_vm1 = vweird.f32 %v1818_v21  ;;  %v1828_v26 = vand.u32 2147483647, %v1818_v21 }
0x163c   :  { %v1831_v28 = vor.u32 1.1754944e-38, %v1830_v29  ;;  %vm1829_vm3 = vcmp.eq.f32.partialorder %v1828_v26, 8.507059e+37 }
0x1640   :  { %v2733_v23 = vpop.eup %2732 }
0x1641   :  { %v1820_v24 = vmul.f32 %v2733_v23, %v1818_v21  ;;  %vm1825_vm0 = vweird.f32 %v2733_v23 }
0x1642   :  { %vm1826_vm2 = vmor %vm1824_vm1, %vm1825_vm0  ;;  %vm2125_vm1 = vcmask 9216  }
0x1643   :  { %v1821_v20 = vsub.f32 1.0, %v1820_v24 }
0x1645   :  { %v1822_v25 = vmul.f32 %v2733_v23, %v1821_v20 }
0x1647   :  { %v1823_v22 = vadd.f32 %v2733_v23, %v1822_v25 }
0x1649   :  { %v1827_v27 = vsel %vm1826_vm2, %v2733_v23, %v1823_v22 }
0x164a   :  { %v1832_v32 = vsel %vm1829_vm3, %v1831_v28, %v1827_v27 }
0x164b   :  { %v1846_v37 = vsub.f32 1.0, %v1832_v32  ;;  %v1852_v40 = vmul.f32 %v1832_v32, %v1791_v50 }
0x16a1   :  { %v1837_v31 = vpop.permute.xlu1 %1836 }
0x16a2   :  { %v1839_v33 = vmul.f32 %v1837_v31, %v1832_v32 }
0x16a4   :  { %1841 = vrot.lane.b32.xlu2 %v1839_v33, %s2750_s2 }
0x16fe   :  { %v1842_v34 = vpop.permute.xlu2 %1841 }
0x16ff   :  { %v1844_v35 = vadd.f32 %v1842_v34, %v1793_v16 }
0x1701   :  { %2734 = vtanh.f32 %v1844_v35  ;;  %v1987_v35 = vld [vmem:[%s3554_s4 + $0x38] sm:$0x1] }
0x1707   :  { %v2735_v36 = vpop.eup %2734 }
0x1708   :  { %1848 = vrot.lane.b32.xlu0 %v2735_v36, %s2752_s30  ;;  %v2669_v36 = vld [vmem:[%s3554_s4 + $0x40] sm:$0xff] }
0x1709   :  { %2017 = vmatpush.bf16.msra.mxu2 %v2669_v36 }
0x177a   :  { %v1849_v39 = vpop.permute.xlu0 %1848 }
0x177b   :  { %v1851_v42 = vmul.f32 %v1849_v39, %v1846_v37  ;;  %v2035_v37 = vunpack.c.l.b16 %v1987_v35  ;;  %v1981_v39 = vld [vmem:[%s3555_s1] sm:$0x3]  ;;  %s2753_s1 = smov 111  }
0x177d   :  { %v1853_v43 = vadd.f32 %v1852_v40, %v1851_v42  ;;  %v2667_v40 = vld [vmem:[%s3554_s4 + $0x28] sm:$0xff]  ;;  %v1982_v42 = vpack.c.bf16 %v1981_v39, %v1981_v39 }
0x177f   :  { %v1856_v44 = vpack.c.bf16 %v1853_v43, %v1853_v43  ;;  %2556 = vmatmul.msk.bf16.vlgmr.msra.gmra.mxu2 %vm2001_vm13, %v1982_v42 }
0x1781   :  { %1858 = vrot.lane.b32.xlu1 %v1856_v44, %s2752_s30  ;;  %v2668_v44 = vld [vmem:[%s3554_s4 + $0x30] sm:$0xff] }
0x17f3   :  { %v1859_v45 = vpop.permute.xlu1 %1858 }
0x17f4   :  { %2548 = vmatmul.msk.bf16.vlgmr.msrb.gmra.mxu0 %vm1231_vm10, %v1859_v45 }
0x1871   :  { %v1872_v46 = vpop.f32.mrf.mxu0 }
0x1872   :  { %v1896_v49 = vadd.f32 %v1872_v46, %v3417_v38  ;;  %v1876_v53 = vadd.f32 %v1872_v46, %v1855_v52 }
0x1874   :  { %1898 = vrot.lane.b32.xlu2 %v1896_v49, %s2751_s27  ;;  %v2549_v54 = vmul.f32 -1.442695, %v1876_v53 }
0x1876   :  { %2736 = vpow2.f32 %v2549_v54 }
0x1879   :  { %v1874_v51 = vpop.f32.mrf.mxu0 }
0x187c   :  { %v2737_v55 = vpop.eup %2736 }
0x187d   :  { %v1880_v56 = vadd.f32 1.0, %v2737_v55 }
0x187f   :  { %2738 = vrcp.f32 %v1880_v56  ;;  %v1892_v61 = vand.u32 2147483648, %v1880_v56  ;;  %vm1886_vm5 = vweird.f32 %v1880_v56  ;;  %v1890_v62 = vand.u32 2147483647, %v1880_v56 }
0x1881   :  { %v1893_v41 = vor.u32 1.1754944e-38, %v1892_v61  ;;  %vm1891_vm7 = vcmp.eq.f32.partialorder %v1890_v62, 8.507059e+37 }
0x1885   :  { %v2739_v57 = vpop.eup %2738 }
0x1886   :  { %v1882_v58 = vmul.f32 %v2739_v57, %v1880_v56  ;;  %vm1887_vm4 = vweird.f32 %v2739_v57 }
0x1887   :  { %vm1888_vm6 = vmor %vm1886_vm5, %vm1887_vm4 }
0x1888   :  { %v1883_v30 = vsub.f32 1.0, %v1882_v58 }
0x188a   :  { %v1884_v59 = vmul.f32 %v2739_v57, %v1883_v30 }
0x188c   :  { %v1885_v60 = vadd.f32 %v2739_v57, %v1884_v59 }
0x188e   :  { %v1889_v0 = vsel %vm1888_vm6, %v2739_v57, %v1885_v60  ;;  %v2019_v60 = vpop.f32.mrf.mxu2 }
0x188f   :  { %v1894_v2 = vsel %vm1891_vm7, %v1893_v41, %v1889_v0 }
0x1890   :  { %v1908_v7 = vsub.f32 1.0, %v1894_v2  ;;  %v1914_v9 = vmul.f32 %v1894_v2, %v1853_v43 }
0x1896   :  { %v2021_v61 = vpop.f32.mrf.mxu2 }
0x18ce   :  { %v1899_v1 = vpop.permute.xlu2 %1898 }
0x18cf   :  { %v1901_v4 = vmul.f32 %v1899_v1, %v1894_v2  ;;  %v2060_v2 = vld [vmem:[%s3553_s5 + $0x4] ss:$0 sm:$0xff] }
0x18d1   :  { %1903 = vrot.lane.b32.xlu0 %v1901_v4, %s2750_s2 }
0x1943   :  { %v1904_v3 = vpop.permute.xlu0 %1903 }
0x1944   :  { %v1906_v5 = vadd.f32 %v1904_v3, %v1855_v52 }
0x1946   :  { %2740 = vtanh.f32 %v1906_v5 }
0x194c   :  { %v2741_v6 = vpop.eup %2740 }
0x194d   :  { %1910 = vrot.lane.b32.xlu1 %v2741_v6, %s2752_s30 }
0x19bf   :  { %v1911_v8 = vpop.permute.xlu1 %1910 }
0x19c0   :  { %v1913_v10 = vmul.f32 %v1911_v8, %v1908_v7 }
0x19c2   :  { %v1915_v11 = vadd.f32 %v1914_v9, %v1913_v10 }
0x19c4   :  { %v1918_v50 = vpack.c.bf16 %v1915_v11, %v1915_v11 }
0x19c6   :  { %1920 = vrot.lane.b32.xlu2 %v1918_v50, %s2752_s30  ;;  %v2120_v50 = vld [vmem:[%s3553_s5 + $0x5] ss:$0 sm:$0xff] }
0x1a20   :  { %v1921_v12 = vpop.permute.xlu2 %1920 }
0x1a21   :  { %2550 = vmatmul.msk.bf16.vlgmr.msra.gmra.mxu1 %vm1231_vm10, %v1921_v12 }
0x1a9e   :  { %v1934_v13 = vpop.f32.mrf.mxu1 }
0x1a9f   :  { %v1958_v14 = vadd.f32 %v1934_v13, %v3417_v38  ;;  %v1938_v16 = vadd.f32 %v1934_v13, %v1917_v63 }
0x1aa1   :  { %1960 = vrot.lane.b32.xlu0 %v1958_v14, %s2751_s27  ;;  %v2551_v17 = vmul.f32 -1.442695, %v1938_v16 }
0x1aa3   :  { %2742 = vpow2.f32 %v2551_v17 }
0x1aa6   :  { %v1936_v15 = vpop.f32.mrf.mxu1 }
0x1aa9   :  { %v2743_v18 = vpop.eup %2742 }
0x1aaa   :  { %v1942_v19 = vadd.f32 1.0, %v2743_v18 }
0x1aac   :  { %2744 = vrcp.f32 %v1942_v19  ;;  %v1954_v22 = vand.u32 2147483648, %v1942_v19  ;;  %vm1948_vm9 = vweird.f32 %v1942_v19  ;;  %v1952_v29 = vand.u32 2147483647, %v1942_v19 }
0x1aae   :  { %v1955_v26 = vor.u32 1.1754944e-38, %v1954_v22  ;;  %vm1953_vm12 = vcmp.eq.f32.partialorder %v1952_v29, 8.507059e+37 }
0x1ab2   :  { %v2745_v21 = vpop.eup %2744 }
0x1ab3   :  { %v1944_v23 = vmul.f32 %v2745_v21, %v1942_v19  ;;  %vm1949_vm8 = vweird.f32 %v2745_v21 }
0x1ab4   :  { %vm1950_vm11 = vmor %vm1948_vm9, %vm1949_vm8 }
0x1ab5   :  { %v1945_v24 = vsub.f32 1.0, %v1944_v23 }
0x1ab7   :  { %v1946_v20 = vmul.f32 %v2745_v21, %v1945_v24 }
0x1ab9   :  { %v1947_v25 = vadd.f32 %v2745_v21, %v1946_v20 }
0x1abb   :  { %v1951_v38 = vsel %vm1950_vm11, %v2745_v21, %v1947_v25 }
0x1abc   :  { %v1956_v28 = vsel %vm1953_vm12, %v1955_v26, %v1951_v38 }
0x1abd   :  { %v1970_v45 = vsub.f32 1.0, %v1956_v28  ;;  %v1976_v49 = vmul.f32 %v1956_v28, %v1915_v11 }
0x1b13   :  { %v1961_v27 = vpop.permute.xlu0 %1960 }
0x1b14   :  { %v1963_v31 = vmul.f32 %v1961_v27, %v1956_v28 }
0x1b16   :  { %1965 = vrot.lane.b32.xlu1 %v1963_v31, %s2750_s2 }
0x1b88   :  { %v1966_v32 = vpop.permute.xlu1 %1965 }
0x1b89   :  { %v1968_v33 = vadd.f32 %v1966_v32, %v1917_v63 }
0x1b8b   :  { %2746 = vtanh.f32 %v1968_v33 }
0x1b91   :  { %v2747_v34 = vpop.eup %2746 }
0x1b92   :  { %1972 = vrot.lane.b32.xlu2 %v2747_v34, %s2752_s30 }
0x1b9a   :  { %2071 = vrot.lane.b32.xlu2 %v3457_v47, %s2752_s30  ;;  %v2038_v47 = vpack.c.b16 %v2035_v37, %v2035_v37 }
0x1b9c   :  { %v2045_v43 = vsel %vm1235_vm14, %v2038_v47, 0  ;;  %2097 = vrot.lane.b32.xlu1 %v2038_v47, %s2752_s30 }
0x1b9d   :  { %2052 = vmatpush.bf16.msra.mxu3 %v2045_v43 }
0x1ba1   :  { %2053 = vmatpush.bf16.msra.mxu3 %v2668_v44 }
0x1ba2   :  { %2093 = vrot.lane.b32.xlu2 %v2667_v40, %s2752_s30 }
0x1ba4   :  { %2069 = vrot.lane.b32.xlu1 %v2669_v36, %s2752_s30 }
0x1ba5   :  { %2054 = vmatpush.bf16.msra.mxu3 %v2667_v40 }
0x1bec   :  { %v1973_v46 = vpop.permute.xlu2 %1972 }
0x1bed   :  { %v1975_v51 = vmul.f32 %v1973_v46, %v1970_v45 }
0x1bef   :  { %v1977_v52 = vadd.f32 %v1976_v49, %v1975_v51 }
0x1bf1   :  { %v1979_v53 = vmul.f32 0.01, %v1977_v52  ;;  %vm1978_vm15 = vcmp.gt.f32.partialorder %v1977_v52, 0.0 }
0x1bf3   :  { %v1980_v54 = vsel %vm1978_vm15, %v1977_v52, %v1979_v53 }
0x1bf4   :  { %v1991_v55 = vpack.c.bf16 %v1980_v54, %v1980_v54  ;;  %v2072_v56 = vpop.permute.xlu2 %2071 }
0x1bf5   :  { %v2078_v57 = vand.u32 %v2072_v56, %v3461_v48 }
0x1bf6   :  { %2024 = vrot.lane.b32.xlu0 %v1991_v55, %s2752_s30 }
0x1bf7   :  { %2086 = vmatpush.bf16.msra.mxu0 %v2078_v57 }
0x1bfc   :  { %v2094_v1 = vpop.permute.xlu2 %2093 }
0x1bfe   :  { %2095 = vrot.lane.b32.xlu0 %v2668_v44, %s2752_s30 }
0x1c06   :  { %2067 = vrot.lane.b32.xlu0 %v1982_v42, %s2753_s1 }
0x1c0e   :  { %v2098_v58 = vpop.permute.xlu1 %2097 }
0x1c0f   :  { %v2105_v30 = vsel %vm1235_vm14, %v2098_v58, 0 }
0x1c10   :  { %2112 = vmatpush.bf16.msrb.mxu1 %v2105_v30 }
0x1c16   :  { %v2070_v59 = vpop.permute.xlu1 %2069 }
0x1c17   :  { %2087 = vmatpush.bf16.msra.mxu0 %v2070_v59 }
0x1c68   :  { %v2025_v62 = vpop.permute.xlu0 %2024 }
0x1c69   :  { %2565 = vmatmul.msk.bf16.vlgmr.msra.gmra.mxu3 %vm1231_vm10, %v2025_v62 }
0x1c70   :  { %v2096_v0 = vpop.permute.xlu0 %2095 }
0x1c71   :  { %2113 = vmatpush.bf16.msrb.mxu1 %v2096_v0 }
0x1c75   :  { %2114 = vmatpush.bf16.msrb.mxu1 %v2094_v1 }
0x1c78   :  { %v2068_v41 = vpop.permute.xlu0 %2067 }
0x1c79   :  { %2566 = vmatmul.msk.bf16.vlgmr.msra.gmra.mxu0 %vm2001_vm13, %v2068_v41 }
0x1cec   :  { %v2056_v48 = vpop.f32.mrf.mxu3 }
0x1ced   :  { %v2057_v4 = vadd.f32 %v2056_v48, %v2019_v60 }
0x1cef   :  { %v2061_v3 = vadd.f32 %v2060_v2, %v2057_v4 }
0x1cf1   :  { %vm2062_vm14 = vcmp.gt.f32.partialorder %v2061_v3, 0.0  ;;  %v2063_v5 = vmul.f32 0.01, %v2061_v3 }
0x1cf3   :  { %v2064_v6 = vsel %vm2062_vm14, %v2061_v3, %v2063_v5 }
0x1cf4   :  { %v2065_v7 = vpack.c.bf16 %v2064_v6, %v2064_v6  ;;  %v2058_v8 = vpop.f32.mrf.mxu3 }
0x1cf6   :  { %2567 = vmatmul.msk.bf16.vlgmr.msrb.gmra.mxu1 %vm1231_vm10, %v2065_v7  ;;  %v2089_v9 = vpop.f32.mrf.mxu0 }
0x1cfe   :  { %v2091_v10 = vpop.f32.mrf.mxu0 }
0x1d73   :  { %v2116_v11 = vpop.f32.mrf.mxu1 }
0x1d74   :  { %v2117_v12 = vadd.f32 %v2116_v11, %v2089_v9 }
0x1d76   :  { %v2121_v13 = vadd.f32 %v2120_v50, %v2117_v12 }
0x1d78   :  { %vm2122_vm0 = vcmp.gt.f32.partialorder %v2121_v13, 0.0  ;;  %v2123_v14 = vmul.f32 0.01, %v2121_v13 }
0x1d7a   :  { %v2124_v15 = vsel %vm2122_vm0, %v2121_v13, %v2123_v14 }
0x1d7b   :  { %2126 = vst.msk [vmem:[%s3556_s6] sm:$0x3] %vm2125_vm1, %v2124_v15  ;;  %v2118_v63 = vpop.f32.mrf.mxu1 }

</bundles_post_ra>
